<compile_context>
chip_gen: v7x
topology: tpu7x:2x2x1
jax: 0.10.0
libtpu: 0.0.40
codegen_flags: <defaults>
</compile_context>

<pallas_src>
import jax
import jax.numpy as jnp
from jax import lax
from jax.experimental import pallas as pl
from jax.experimental.pallas import tpu as pltpu

# Small, self-consistent sizes for the synthetic module.
HIDDEN_DIM = 32
Z_DIM = 16
VOCAB_SIZE = 32
PAD_IDX = 0
OUT_LANES = 128          # lane-dense padded width of the fc_out head (>= VOCAB_SIZE)


def _vmem():
    return pl.BlockSpec(memory_space=pltpu.MemorySpace.VMEM)


# ---------------- fully fused VAE forward kernel ----------------
def vae_fused_kernel(ids_ref, eps_ref, w_ref, c_ref, logits_ref, mulv_ref, hdec_ref):
    TB = ids_ref.shape[0]
    B, Z = eps_ref.shape
    T = TB // B
    V = VOCAB_SIZE
    H = w_ref.shape[1] // 8
    H2, H4 = 2 * H, 4 * H
    OL = logits_ref.shape[1]

    # ---- carve the packed bf16 weight slab (static slices, zero runtime cost) ----
    o_xw = 0                      # (2V, 8H)  folded emb@Wi, gate-interleaved, fwd/bwd blocks
    o_hw = o_xw + 2 * V           # (2H, 8H)  block-diag gate-interleaved Wh for both dirs
    o_mulv = o_hw + H2            # (2H, 2Z)  [fc_mu | fc_logvar]
    o_zw = o_mulv + H2            # (Z, H)    fc_z
    o_dwi = o_zw + Z              # (H, 4H)   decoder Wi
    o_dwh = o_dwi + H             # (H, 4H)   decoder Wh
    o_ow = o_dwh + H              # (H, OL)   fc_out padded to 128 lanes

    enc_xw = w_ref[o_xw:o_hw, :]
    enc_hw = w_ref[o_hw:o_mulv, :]
    mulv_w = w_ref[o_mulv:o_zw, 0:2 * Z]
    zw = w_ref[o_zw:o_dwi, 0:H]
    dwi = w_ref[o_dwi:o_dwh, 0:H4]
    dwh = w_ref[o_dwh:o_ow, 0:H4]
    ow = w_ref[o_ow:o_ow + H, 0:OL]

    # ---- carve the f32 bias slab ----
    b_enc = c_ref[0:1, :]                 # (1, 8H) gate-interleaved fused b_ih+b_hh (fwd|bwd)
    b_dec = c_ref[1:2, 0:H4]              # (1, 4H)
    b_out = c_ref[2:3, 0:OL]              # (1, OL)
    b_mulv = c_ref[3:4, 0:2 * Z]          # (1, 2Z)
    b_z = c_ref[4:5, 0:H]                 # (1, H)
    eps = eps_ref[...]                    # (B, Z) f32

    # ---- all-timestep encoder input gates: ONE (T*B, 2V) @ (2V, 8H) MXU pass ----
    ids = ids_ref[...]                                            # (TB, 2) int32: [fwd | rev]
    iota_v = lax.broadcasted_iota(jnp.int32, (TB, V), 1)
    oh_f = (ids[:, 0:1] == iota_v).astype(jnp.float32)
    oh_b = (ids[:, 1:2] == iota_v).astype(jnp.float32)
    onehot = jnp.concatenate([oh_f, oh_b], axis=1).astype(jnp.bfloat16)   # (TB, 2V)
    xg_all = jnp.dot(onehot, enc_xw, preferred_element_type=jnp.float32) + b_enc   # (TB, 8H)

    # ---- encoder biLSTM: fwd + bwd fused, one MXU push per step, fully unrolled ----
    # Gate lane layout: [i_f|i_b, f_f|f_b, g_f|g_b, o_f|o_b], each block 2H wide.
    h_cat = jnp.zeros((B, H2), jnp.float32)   # [hf | hb]
    c_cat = jnp.zeros((B, H2), jnp.float32)
    for t in range(T):                                            # static -> full unroll
        gates = xg_all[t * B:(t + 1) * B, :] + jnp.dot(
            h_cat.astype(jnp.bfloat16), enc_hw, preferred_element_type=jnp.float32)
        sg = jax.nn.sigmoid(gates)                                # one EUP pass, 256 lanes
        th = jnp.tanh(gates)
        c_cat = sg[:, H2:2 * H2] * c_cat + sg[:, 0:H2] * th[:, 2 * H2:3 * H2]
        h_cat = sg[:, 3 * H2:4 * H2] * jnp.tanh(c_cat)
    # h_cat == [fwd final hidden | bwd final hidden]
    # == torch.cat((h[:, -1, :H], h[:, 0, H:]), dim=1)
    h_enc = h_cat                                                 # (B, 2H)

    # ---- fc_mu + fc_logvar fused into one matmul, then reparameterize + fc_z ----
    mulv = jnp.dot(h_enc.astype(jnp.bfloat16), mulv_w,
                   preferred_element_type=jnp.float32) + b_mulv   # (B, 2Z)
    mulv_ref[...] = mulv
    mu = mulv[:, 0:Z]
    logvar = mulv[:, Z:2 * Z]
    z = mu + eps * jnp.exp(0.5 * logvar)                          # (B, Z)
    zh = jnp.dot(z.astype(jnp.bfloat16), zw,
                 preferred_element_type=jnp.float32) + b_z        # (B, H)

    # ---- decoder LSTM: constant input, x @ Wi + b hoisted out of the loop ----
    gx = jnp.dot(zh.astype(jnp.bfloat16), dwi,
                 preferred_element_type=jnp.float32) + b_dec      # (B, 4H), computed once
    hd = jnp.zeros((B, H), jnp.float32)
    cd = jnp.zeros((B, H), jnp.float32)
    for t in range(T):                                            # static -> full unroll
        gates = gx + jnp.dot(hd.astype(jnp.bfloat16), dwh,
                             preferred_element_type=jnp.float32)  # (B, 4H)
        sg = jax.nn.sigmoid(gates)
        th = jnp.tanh(gates)
        cd = sg[:, H:2 * H] * cd + sg[:, 0:H] * th[:, 2 * H:3 * H]
        hd = sg[:, 3 * H:4 * H] * jnp.tanh(cd)
        hdec_ref[t * B:(t + 1) * B, :] = hd                       # in-place, no concat

    # ---- fc_out on the whole decoder slab, lane-dense 128-wide store ----
    logits_ref[...] = jnp.dot(hdec_ref[...].astype(jnp.bfloat16), ow,
                              preferred_element_type=jnp.float32) + b_out


# ---------------- wrapper (per-call work only: id layout + the one pallas_call) ----------------
def vae_forward(packed, x_ids, eps):
    """Matches VAE.forward(x, seq_len) with seq_len = x.shape[1]; eps replaces torch.randn_like."""
    B, T = x_ids.shape
    V, Z = VOCAB_SIZE, Z_DIM
    TB = T * B

    ids_tm = jnp.transpose(x_ids).astype(jnp.int32)               # (T, B) time-major
    ids_2 = jnp.stack([ids_tm.reshape(TB), ids_tm[::-1].reshape(TB)], axis=1)   # (TB, 2)

    logits, mulv = pl.pallas_call(
        vae_fused_kernel,
        out_shape=(jax.ShapeDtypeStruct((TB, OUT_LANES), jnp.float32),
                   jax.ShapeDtypeStruct((B, 2 * Z), jnp.float32)),
        in_specs=[_vmem()] * 4,
        out_specs=(_vmem(), _vmem()),
        scratch_shapes=[pltpu.VMEM((TB, HIDDEN_DIM), jnp.float32)],
    )(ids_2, eps, packed['wslab'], packed['cslab'])

    recon_x = jnp.transpose(logits[:, :V].reshape(T, B, V), (1, 0, 2))   # (B, T, V)
    mu = mulv[:, :Z]
    logvar = mulv[:, Z:]
    return recon_x, mu, logvar


# ---------------- deterministic parameter init (shapes follow VAE.__init__) ----------------
def init_params(key, vocab_size, hidden_dim, z_dim, pad_idx):
    V, H, Z = vocab_size, hidden_dim, z_dim
    ks = list(jax.random.split(key, 24))

    def u(k, shape, scale):
        return jax.random.uniform(k, shape, jnp.float32, -scale, scale)

    s_lstm = 1.0 / (H ** 0.5)
    s_2h = 1.0 / ((2 * H) ** 0.5)
    s_z = 1.0 / (Z ** 0.5)
    s_h = 1.0 / (H ** 0.5)

    emb = jax.random.normal(ks[0], (V, H), jnp.float32)
    emb = emb.at[pad_idx].set(0.0)   # nn.Embedding(padding_idx=...) zeroes the pad row

    return {
        'emb': emb,
        # encoder biLSTM (weights stored transposed: (in, 4H), gate order [i,f,g,o]);
        # bias = b_ih + b_hh
        'enc_wi_f': u(ks[1], (H, 4 * H), s_lstm),
        'enc_wh_f': u(ks[2], (H, 4 * H), s_lstm),
        'enc_b_f': u(ks[3], (1, 4 * H), s_lstm) + u(ks[4], (1, 4 * H), s_lstm),
        'enc_wi_b': u(ks[5], (H, 4 * H), s_lstm),
        'enc_wh_b': u(ks[6], (H, 4 * H), s_lstm),
        'enc_b_b': u(ks[7], (1, 4 * H), s_lstm) + u(ks[8], (1, 4 * H), s_lstm),
        # fc_mu / fc_logvar: Linear(2H -> Z), stored as (2H, Z)
        'fc_mu_w': u(ks[9], (2 * H, Z), s_2h),
        'fc_mu_b': u(ks[10], (1, Z), s_2h),
        'fc_logvar_w': u(ks[11], (2 * H, Z), s_2h),
        'fc_logvar_b': u(ks[12], (1, Z), s_2h),
        # fc_z: Linear(Z -> H)
        'fc_z_w': u(ks[13], (Z, H), s_z),
        'fc_z_b': u(ks[14], (1, H), s_z),
        # decoder LSTM
        'dec_wi': u(ks[15], (H, 4 * H), s_lstm),
        'dec_wh': u(ks[16], (H, 4 * H), s_lstm),
        'dec_b': u(ks[17], (1, 4 * H), s_lstm) + u(ks[18], (1, 4 * H), s_lstm),
        # fc_out: Linear(H -> V)
        'fc_out_w': u(ks[19], (H, V), s_h),
        'fc_out_b': u(ks[20], (1, V), s_h),
    }


# ---------------- one-time weight fusion / packing (outside the per-call forward path) ----------------
def pack_params(p):
    H, V, Z = HIDDEN_DIM, VOCAB_SIZE, Z_DIM
    H4, H8 = 4 * H, 8 * H

    def interleave_cols(m_f, m_b):
        # (R, 4H) x 2 -> (R, 8H) with layout [i_f|i_b, f_f|f_b, g_f|g_b, o_f|o_b]
        parts = []
        for g in range(4):
            parts.append(m_f[:, g * H:(g + 1) * H])
            parts.append(m_b[:, g * H:(g + 1) * H])
        return jnp.concatenate(parts, axis=1)

    # Fold the embedding into the encoder input projection (exact: onehot@(E@Wi) == (onehot@E)@Wi).
    ewi_f = p['emb'] @ p['enc_wi_f']            # (V, 4H)
    ewi_b = p['emb'] @ p['enc_wi_b']
    zv = jnp.zeros((V, H4), jnp.float32)
    zh = jnp.zeros((H, H4), jnp.float32)
    enc_xw = jnp.concatenate([interleave_cols(ewi_f, zv),
                              interleave_cols(zv, ewi_b)], axis=0)            # (2V, 8H)
    enc_hw = jnp.concatenate([interleave_cols(p['enc_wh_f'], zh),
                              interleave_cols(zh, p['enc_wh_b'])], axis=0)    # (2H, 8H)
    enc_b = interleave_cols(p['enc_b_f'], p['enc_b_b'])                       # (1, 8H)

    mulv_w = jnp.concatenate([p['fc_mu_w'], p['fc_logvar_w']], axis=1)        # (2H, 2Z)
    mulv_b = jnp.concatenate([p['fc_mu_b'], p['fc_logvar_b']], axis=1)        # (1, 2Z)
    ow_pad = jnp.zeros((H, OUT_LANES), jnp.float32).at[:, :V].set(p['fc_out_w'])
    ob_pad = jnp.zeros((1, OUT_LANES), jnp.float32).at[:, :V].set(p['fc_out_b'])

    def pad_cols(m):
        return jnp.pad(m, ((0, 0), (0, H8 - m.shape[1])))

    # bf16 weight slab: (2V + 2H + 2H + Z + H + H + H, 8H) = (304, 256); all row offsets
    # are multiples of 16 (bf16 sublane tile).
    wslab = jnp.concatenate([
        pad_cols(enc_xw), pad_cols(enc_hw), pad_cols(mulv_w), pad_cols(p['fc_z_w']),
        pad_cols(p['dec_wi']), pad_cols(p['dec_wh']), pad_cols(ow_pad)],
        axis=0).astype(jnp.bfloat16)

    # f32 bias slab: (8, 256)
    cslab = jnp.concatenate([
        pad_cols(enc_b), pad_cols(p['dec_b']), pad_cols(ob_pad),
        pad_cols(mulv_b), pad_cols(p['fc_z_b']),
        jnp.zeros((3, H8), jnp.float32)], axis=0)

    return {'wslab': wslab, 'cslab': cslab}


# ---------------- pure-JAX f32 reference (PyTorch semantics) for a tolerance check ----------------
def vae_reference(p, x_ids, eps):
    B, T = x_ids.shape
    H = HIDDEN_DIM
    emb = p['emb'][x_ids]                       # (B, T, H)

    def lstm(xs, wi, wh, b):                    # xs: (T, B, H)
        def step(carry, x):
            h, c = carry
            g = x @ wi + h @ wh + b
            i = jax.nn.sigmoid(g[:, 0:H]); f = jax.nn.sigmoid(g[:, H:2 * H])
            gg = jnp.tanh(g[:, 2 * H:3 * H]); o = jax.nn.sigmoid(g[:, 3 * H:4 * H])
            c = f * c + i * gg
            h = o * jnp.tanh(c)
            return (h, c), h
        (h, _), hs = lax.scan(step, (jnp.zeros((B, H)), jnp.zeros((B, H))), xs)
        return hs, h

    xs = jnp.transpose(emb, (1, 0, 2))          # (T, B, H)
    _, hf = lstm(xs, p['enc_wi_f'], p['enc_wh_f'], p['enc_b_f'])
    _, hb = lstm(xs[::-1], p['enc_wi_b'], p['enc_wh_b'], p['enc_b_b'])
    h_enc = jnp.concatenate([hf, hb], axis=1)
    mu = h_enc @ p['fc_mu_w'] + p['fc_mu_b']
    logvar = h_enc @ p['fc_logvar_w'] + p['fc_logvar_b']
    z = mu + eps * jnp.exp(0.5 * logvar)
    zh = z @ p['fc_z_w'] + p['fc_z_b']
    xs_dec = jnp.broadcast_to(zh, (T, B, H))
    hs_d, _ = lstm(xs_dec, p['dec_wi'], p['dec_wh'], p['dec_b'])
    logits = hs_d @ p['fc_out_w'] + p['fc_out_b']                  # (T, B, V)
    return jnp.transpose(logits, (1, 0, 2)), mu, logvar


if __name__ == "__main__":
    B, T = 2, 8
    key = jax.random.PRNGKey(0)
    k_param, k_data, k_eps = jax.random.split(key, 3)

    params = init_params(k_param, VOCAB_SIZE, HIDDEN_DIM, Z_DIM, PAD_IDX)
    packed = pack_params(params)                 # one-time fusion/packing (not per forward)
    x = jax.random.randint(k_data, (B, T), 0, VOCAB_SIZE, dtype=jnp.int32)
    # torch.randn_like(std) in reparameterize -> deterministic eps supplied here
    eps = jax.random.normal(k_eps, (B, Z_DIM), jnp.float32)

    recon_x, mu, logvar = jax.jit(vae_forward)(packed, x, eps)
    jax.block_until_ready((recon_x, mu, logvar))

    assert recon_x.shape == (B, T, VOCAB_SIZE)
    assert mu.shape == (B, Z_DIM) and logvar.shape == (B, Z_DIM)
    assert bool(jnp.all(jnp.isfinite(recon_x)))
    assert bool(jnp.all(jnp.isfinite(mu))) and bool(jnp.all(jnp.isfinite(logvar)))

    # bf16-matmul kernel vs f32 reference (loose tolerance for bf16 operand rounding)
    r_ref, mu_ref, lv_ref = jax.jit(vae_reference)(params, x, eps)
    assert bool(jnp.allclose(recon_x, r_ref, atol=0.15, rtol=0.1))
    assert bool(jnp.allclose(mu, mu_ref, atol=0.15, rtol=0.1))
    assert bool(jnp.allclose(logvar, lv_ref, atol=0.15, rtol=0.1))

    print("KERNEL_OK")
</pallas_src>

<mosaic_0001>
module attributes {stable_mosaic.version = 11 : i64} {
  func.func @vae_fused_kernel(%arg0: memref<16x2xi32, #tpu.memory_space<vmem>>, %arg1: memref<2x16xf32, #tpu.memory_space<vmem>>, %arg2: memref<304x256xbf16, #tpu.memory_space<vmem>>, %arg3: memref<8x256xf32, #tpu.memory_space<vmem>>, %arg4: memref<16x128xf32, #tpu.memory_space<vmem>>, %arg5: memref<2x32xf32, #tpu.memory_space<vmem>>, %arg6: memref<16x32xf32, #tpu.memory_space<vmem>>) attributes {dimension_semantics = [], scalar_prefetch = 0 : i64, scratch_operands = 1 : i64, tpu.core_type = #tpu.core_type<tc>} {
    %c0 = arith.constant 0 : index
    %c0_0 = arith.constant 0 : index
    %0 = vector.load %arg2[%c0, %c0_0] : memref<304x256xbf16, #tpu.memory_space<vmem>>, vector<64x256xbf16>
    %c64 = arith.constant 64 : index
    %c0_1 = arith.constant 0 : index
    %1 = vector.load %arg2[%c64, %c0_1] : memref<304x256xbf16, #tpu.memory_space<vmem>>, vector<64x256xbf16>
    %c128 = arith.constant 128 : index
    %c0_2 = arith.constant 0 : index
    %2 = vector.load %arg2[%c128, %c0_2] : memref<304x256xbf16, #tpu.memory_space<vmem>>, vector<64x32xbf16>
    %c192 = arith.constant 192 : index
    %c0_3 = arith.constant 0 : index
    %3 = vector.load %arg2[%c192, %c0_3] : memref<304x256xbf16, #tpu.memory_space<vmem>>, vector<16x32xbf16>
    %c208 = arith.constant 208 : index
    %c0_4 = arith.constant 0 : index
    %4 = vector.load %arg2[%c208, %c0_4] : memref<304x256xbf16, #tpu.memory_space<vmem>>, vector<32x128xbf16>
    %c240 = arith.constant 240 : index
    %c0_5 = arith.constant 0 : index
    %5 = vector.load %arg2[%c240, %c0_5] : memref<304x256xbf16, #tpu.memory_space<vmem>>, vector<32x128xbf16>
    %c272 = arith.constant 272 : index
    %c0_6 = arith.constant 0 : index
    %6 = vector.load %arg2[%c272, %c0_6] : memref<304x256xbf16, #tpu.memory_space<vmem>>, vector<32x128xbf16>
    %c0_7 = arith.constant 0 : index
    %c0_8 = arith.constant 0 : index
    %7 = vector.load %arg3[%c0_7, %c0_8] : memref<8x256xf32, #tpu.memory_space<vmem>>, vector<1x256xf32>
    %c1 = arith.constant 1 : index
    %c0_9 = arith.constant 0 : index
    %8 = vector.load %arg3[%c1, %c0_9] : memref<8x256xf32, #tpu.memory_space<vmem>>, vector<1x128xf32>
    %c2 = arith.constant 2 : index
    %c0_10 = arith.constant 0 : index
    %9 = vector.load %arg3[%c2, %c0_10] : memref<8x256xf32, #tpu.memory_space<vmem>>, vector<1x128xf32>
    %c3 = arith.constant 3 : index
    %c0_11 = arith.constant 0 : index
    %10 = vector.load %arg3[%c3, %c0_11] : memref<8x256xf32, #tpu.memory_space<vmem>>, vector<1x32xf32>
    %c4 = arith.constant 4 : index
    %c0_12 = arith.constant 0 : index
    %11 = vector.load %arg3[%c4, %c0_12] : memref<8x256xf32, #tpu.memory_space<vmem>>, vector<1x32xf32>
    %c0_13 = arith.constant 0 : index
    %c0_14 = arith.constant 0 : index
    %12 = vector.load %arg1[%c0_13, %c0_14] : memref<2x16xf32, #tpu.memory_space<vmem>>, vector<2x16xf32>
    %c0_15 = arith.constant 0 : index
    %c0_16 = arith.constant 0 : index
    %13 = vector.load %arg0[%c0_15, %c0_16] : memref<16x2xi32, #tpu.memory_space<vmem>>, vector<16x2xi32>
    %14 = tpu.iota {dimensions = array<i32: 1>} : vector<16x32xi32>
    %15 = vector.extract_strided_slice %13 {offsets = [0, 0], sizes = [16, 1], strides = [1, 1]} : vector<16x2xi32> to vector<16x1xi32>
    %16 = vector.broadcast %15 : vector<16x1xi32> to vector<16x32xi32>
    %17 = arith.cmpi eq, %16, %14 : vector<16x32xi32>
    %18 = arith.extui %17 : vector<16x32xi1> to vector<16x32xi32>
    %19 = arith.sitofp %18 : vector<16x32xi32> to vector<16x32xf32>
    %20 = vector.extract_strided_slice %13 {offsets = [0, 1], sizes = [16, 1], strides = [1, 1]} : vector<16x2xi32> to vector<16x1xi32>
    %21 = vector.broadcast %20 : vector<16x1xi32> to vector<16x32xi32>
    %22 = arith.cmpi eq, %21, %14 : vector<16x32xi32>
    %23 = arith.extui %22 : vector<16x32xi1> to vector<16x32xi32>
    %24 = arith.sitofp %23 : vector<16x32xi32> to vector<16x32xf32>
    %25 = tpu.concatenate %19, %24 in 1 : vector<16x32xf32>, vector<16x32xf32> -> vector<16x64xf32>
    %26 = arith.truncf %25 : vector<16x64xf32> to vector<16x64xbf16>
    %cst = arith.constant dense<0.000000e+00> : vector<16x256xf32>
    %27 = tpu.matmul %26, %0, %cst {dimension_numbers = #tpu.dot_dimension_numbers<[1], [0], [0], [1], [0, 0, 1, 1], [], []>} : vector<16x64xbf16>, vector<64x256xbf16>, vector<16x256xf32> -> vector<16x256xf32>
    %28 = vector.broadcast %7 : vector<1x256xf32> to vector<16x256xf32>
    %29 = arith.addf %27, %28 : vector<16x256xf32>
    %cst_17 = arith.constant 0.000000e+00 : f32
    %30 = vector.broadcast %cst_17 : f32 to vector<2x64xf32>
    %cst_18 = arith.constant 0.000000e+00 : f32
    %31 = vector.broadcast %cst_18 : f32 to vector<2x64xf32>
    %32 = vector.extract_strided_slice %29 {offsets = [0, 0], sizes = [2, 256], strides = [1, 1]} : vector<16x256xf32> to vector<2x256xf32>
    %33 = arith.truncf %30 : vector<2x64xf32> to vector<2x64xbf16>
    %cst_19 = arith.constant dense<0.000000e+00> : vector<2x256xf32>
    %34 = tpu.matmul %33, %1, %cst_19 {dimension_numbers = #tpu.dot_dimension_numbers<[1], [0], [0], [1], [0, 0, 1, 1], [], []>} : vector<2x64xbf16>, vector<64x256xbf16>, vector<2x256xf32> -> vector<2x256xf32>
    %35 = arith.addf %32, %34 : vector<2x256xf32>
    %36 = arith.negf %35 : vector<2x256xf32>
    %37 = math.exp %36 : vector<2x256xf32>
    %cst_20 = arith.constant 1.000000e+00 : f32
    %38 = vector.broadcast %cst_20 : f32 to vector<2x256xf32>
    %39 = arith.addf %38, %37 : vector<2x256xf32>
    %40 = arith.divf %38, %39 : vector<2x256xf32>
    %41 = math.tanh %35 : vector<2x256xf32>
    %42 = vector.extract_strided_slice %40 {offsets = [0, 64], sizes = [2, 64], strides = [1, 1]} : vector<2x256xf32> to vector<2x64xf32>
    %43 = arith.mulf %42, %31 : vector<2x64xf32>
    %44 = vector.extract_strided_slice %40 {offsets = [0, 0], sizes = [2, 64], strides = [1, 1]} : vector<2x256xf32> to vector<2x64xf32>
    %45 = vector.extract_strided_slice %41 {offsets = [0, 128], sizes = [2, 64], strides = [1, 1]} : vector<2x256xf32> to vector<2x64xf32>
    %46 = arith.mulf %44, %45 : vector<2x64xf32>
    %47 = arith.addf %43, %46 : vector<2x64xf32>
    %48 = vector.extract_strided_slice %40 {offsets = [0, 192], sizes = [2, 64], strides = [1, 1]} : vector<2x256xf32> to vector<2x64xf32>
    %49 = math.tanh %47 : vector<2x64xf32>
    %50 = arith.mulf %48, %49 : vector<2x64xf32>
    %51 = vector.extract_strided_slice %29 {offsets = [2, 0], sizes = [2, 256], strides = [1, 1]} : vector<16x256xf32> to vector<2x256xf32>
    %52 = arith.truncf %50 : vector<2x64xf32> to vector<2x64xbf16>
    %cst_21 = arith.constant dense<0.000000e+00> : vector<2x256xf32>
    %53 = tpu.matmul %52, %1, %cst_21 {dimension_numbers = #tpu.dot_dimension_numbers<[1], [0], [0], [1], [0, 0, 1, 1], [], []>} : vector<2x64xbf16>, vector<64x256xbf16>, vector<2x256xf32> -> vector<2x256xf32>
    %54 = arith.addf %51, %53 : vector<2x256xf32>
    %55 = arith.negf %54 : vector<2x256xf32>
    %56 = math.exp %55 : vector<2x256xf32>
    %cst_22 = arith.constant 1.000000e+00 : f32
    %57 = vector.broadcast %cst_22 : f32 to vector<2x256xf32>
    %58 = arith.addf %57, %56 : vector<2x256xf32>
    %59 = arith.divf %57, %58 : vector<2x256xf32>
    %60 = math.tanh %54 : vector<2x256xf32>
    %61 = vector.extract_strided_slice %59 {offsets = [0, 64], sizes = [2, 64], strides = [1, 1]} : vector<2x256xf32> to vector<2x64xf32>
    %62 = arith.mulf %61, %47 : vector<2x64xf32>
    %63 = vector.extract_strided_slice %59 {offsets = [0, 0], sizes = [2, 64], strides = [1, 1]} : vector<2x256xf32> to vector<2x64xf32>
    %64 = vector.extract_strided_slice %60 {offsets = [0, 128], sizes = [2, 64], strides = [1, 1]} : vector<2x256xf32> to vector<2x64xf32>
    %65 = arith.mulf %63, %64 : vector<2x64xf32>
    %66 = arith.addf %62, %65 : vector<2x64xf32>
    %67 = vector.extract_strided_slice %59 {offsets = [0, 192], sizes = [2, 64], strides = [1, 1]} : vector<2x256xf32> to vector<2x64xf32>
    %68 = math.tanh %66 : vector<2x64xf32>
    %69 = arith.mulf %67, %68 : vector<2x64xf32>
    %70 = vector.extract_strided_slice %29 {offsets = [4, 0], sizes = [2, 256], strides = [1, 1]} : vector<16x256xf32> to vector<2x256xf32>
    %71 = arith.truncf %69 : vector<2x64xf32> to vector<2x64xbf16>
    %cst_23 = arith.constant dense<0.000000e+00> : vector<2x256xf32>
    %72 = tpu.matmul %71, %1, %cst_23 {dimension_numbers = #tpu.dot_dimension_numbers<[1], [0], [0], [1], [0, 0, 1, 1], [], []>} : vector<2x64xbf16>, vector<64x256xbf16>, vector<2x256xf32> -> vector<2x256xf32>
    %73 = arith.addf %70, %72 : vector<2x256xf32>
    %74 = arith.negf %73 : vector<2x256xf32>
    %75 = math.exp %74 : vector<2x256xf32>
    %cst_24 = arith.constant 1.000000e+00 : f32
    %76 = vector.broadcast %cst_24 : f32 to vector<2x256xf32>
    %77 = arith.addf %76, %75 : vector<2x256xf32>
    %78 = arith.divf %76, %77 : vector<2x256xf32>
    %79 = math.tanh %73 : vector<2x256xf32>
    %80 = vector.extract_strided_slice %78 {offsets = [0, 64], sizes = [2, 64], strides = [1, 1]} : vector<2x256xf32> to vector<2x64xf32>
    %81 = arith.mulf %80, %66 : vector<2x64xf32>
    %82 = vector.extract_strided_slice %78 {offsets = [0, 0], sizes = [2, 64], strides = [1, 1]} : vector<2x256xf32> to vector<2x64xf32>
    %83 = vector.extract_strided_slice %79 {offsets = [0, 128], sizes = [2, 64], strides = [1, 1]} : vector<2x256xf32> to vector<2x64xf32>
    %84 = arith.mulf %82, %83 : vector<2x64xf32>
    %85 = arith.addf %81, %84 : vector<2x64xf32>
    %86 = vector.extract_strided_slice %78 {offsets = [0, 192], sizes = [2, 64], strides = [1, 1]} : vector<2x256xf32> to vector<2x64xf32>
    %87 = math.tanh %85 : vector<2x64xf32>
    %88 = arith.mulf %86, %87 : vector<2x64xf32>
    %89 = vector.extract_strided_slice %29 {offsets = [6, 0], sizes = [2, 256], strides = [1, 1]} : vector<16x256xf32> to vector<2x256xf32>
    %90 = arith.truncf %88 : vector<2x64xf32> to vector<2x64xbf16>
    %cst_25 = arith.constant dense<0.000000e+00> : vector<2x256xf32>
    %91 = tpu.matmul %90, %1, %cst_25 {dimension_numbers = #tpu.dot_dimension_numbers<[1], [0], [0], [1], [0, 0, 1, 1], [], []>} : vector<2x64xbf16>, vector<64x256xbf16>, vector<2x256xf32> -> vector<2x256xf32>
    %92 = arith.addf %89, %91 : vector<2x256xf32>
    %93 = arith.negf %92 : vector<2x256xf32>
    %94 = math.exp %93 : vector<2x256xf32>
    %cst_26 = arith.constant 1.000000e+00 : f32
    %95 = vector.broadcast %cst_26 : f32 to vector<2x256xf32>
    %96 = arith.addf %95, %94 : vector<2x256xf32>
    %97 = arith.divf %95, %96 : vector<2x256xf32>
    %98 = math.tanh %92 : vector<2x256xf32>
    %99 = vector.extract_strided_slice %97 {offsets = [0, 64], sizes = [2, 64], strides = [1, 1]} : vector<2x256xf32> to vector<2x64xf32>
    %100 = arith.mulf %99, %85 : vector<2x64xf32>
    %101 = vector.extract_strided_slice %97 {offsets = [0, 0], sizes = [2, 64], strides = [1, 1]} : vector<2x256xf32> to vector<2x64xf32>
    %102 = vector.extract_strided_slice %98 {offsets = [0, 128], sizes = [2, 64], strides = [1, 1]} : vector<2x256xf32> to vector<2x64xf32>
    %103 = arith.mulf %101, %102 : vector<2x64xf32>
    %104 = arith.addf %100, %103 : vector<2x64xf32>
    %105 = vector.extract_strided_slice %97 {offsets = [0, 192], sizes = [2, 64], strides = [1, 1]} : vector<2x256xf32> to vector<2x64xf32>
    %106 = math.tanh %104 : vector<2x64xf32>
    %107 = arith.mulf %105, %106 : vector<2x64xf32>
    %108 = vector.extract_strided_slice %29 {offsets = [8, 0], sizes = [2, 256], strides = [1, 1]} : vector<16x256xf32> to vector<2x256xf32>
    %109 = arith.truncf %107 : vector<2x64xf32> to vector<2x64xbf16>
    %cst_27 = arith.constant dense<0.000000e+00> : vector<2x256xf32>
    %110 = tpu.matmul %109, %1, %cst_27 {dimension_numbers = #tpu.dot_dimension_numbers<[1], [0], [0], [1], [0, 0, 1, 1], [], []>} : vector<2x64xbf16>, vector<64x256xbf16>, vector<2x256xf32> -> vector<2x256xf32>
    %111 = arith.addf %108, %110 : vector<2x256xf32>
    %112 = arith.negf %111 : vector<2x256xf32>
    %113 = math.exp %112 : vector<2x256xf32>
    %cst_28 = arith.constant 1.000000e+00 : f32
    %114 = vector.broadcast %cst_28 : f32 to vector<2x256xf32>
    %115 = arith.addf %114, %113 : vector<2x256xf32>
    %116 = arith.divf %114, %115 : vector<2x256xf32>
    %117 = math.tanh %111 : vector<2x256xf32>
    %118 = vector.extract_strided_slice %116 {offsets = [0, 64], sizes = [2, 64], strides = [1, 1]} : vector<2x256xf32> to vector<2x64xf32>
    %119 = arith.mulf %118, %104 : vector<2x64xf32>
    %120 = vector.extract_strided_slice %116 {offsets = [0, 0], sizes = [2, 64], strides = [1, 1]} : vector<2x256xf32> to vector<2x64xf32>
    %121 = vector.extract_strided_slice %117 {offsets = [0, 128], sizes = [2, 64], strides = [1, 1]} : vector<2x256xf32> to vector<2x64xf32>
    %122 = arith.mulf %120, %121 : vector<2x64xf32>
    %123 = arith.addf %119, %122 : vector<2x64xf32>
    %124 = vector.extract_strided_slice %116 {offsets = [0, 192], sizes = [2, 64], strides = [1, 1]} : vector<2x256xf32> to vector<2x64xf32>
    %125 = math.tanh %123 : vector<2x64xf32>
    %126 = arith.mulf %124, %125 : vector<2x64xf32>
    %127 = vector.extract_strided_slice %29 {offsets = [10, 0], sizes = [2, 256], strides = [1, 1]} : vector<16x256xf32> to vector<2x256xf32>
    %128 = arith.truncf %126 : vector<2x64xf32> to vector<2x64xbf16>
    %cst_29 = arith.constant dense<0.000000e+00> : vector<2x256xf32>
    %129 = tpu.matmul %128, %1, %cst_29 {dimension_numbers = #tpu.dot_dimension_numbers<[1], [0], [0], [1], [0, 0, 1, 1], [], []>} : vector<2x64xbf16>, vector<64x256xbf16>, vector<2x256xf32> -> vector<2x256xf32>
    %130 = arith.addf %127, %129 : vector<2x256xf32>
    %131 = arith.negf %130 : vector<2x256xf32>
    %132 = math.exp %131 : vector<2x256xf32>
    %cst_30 = arith.constant 1.000000e+00 : f32
    %133 = vector.broadcast %cst_30 : f32 to vector<2x256xf32>
    %134 = arith.addf %133, %132 : vector<2x256xf32>
    %135 = arith.divf %133, %134 : vector<2x256xf32>
    %136 = math.tanh %130 : vector<2x256xf32>
    %137 = vector.extract_strided_slice %135 {offsets = [0, 64], sizes = [2, 64], strides = [1, 1]} : vector<2x256xf32> to vector<2x64xf32>
    %138 = arith.mulf %137, %123 : vector<2x64xf32>
    %139 = vector.extract_strided_slice %135 {offsets = [0, 0], sizes = [2, 64], strides = [1, 1]} : vector<2x256xf32> to vector<2x64xf32>
    %140 = vector.extract_strided_slice %136 {offsets = [0, 128], sizes = [2, 64], strides = [1, 1]} : vector<2x256xf32> to vector<2x64xf32>
    %141 = arith.mulf %139, %140 : vector<2x64xf32>
    %142 = arith.addf %138, %141 : vector<2x64xf32>
    %143 = vector.extract_strided_slice %135 {offsets = [0, 192], sizes = [2, 64], strides = [1, 1]} : vector<2x256xf32> to vector<2x64xf32>
    %144 = math.tanh %142 : vector<2x64xf32>
    %145 = arith.mulf %143, %144 : vector<2x64xf32>
    %146 = vector.extract_strided_slice %29 {offsets = [12, 0], sizes = [2, 256], strides = [1, 1]} : vector<16x256xf32> to vector<2x256xf32>
    %147 = arith.truncf %145 : vector<2x64xf32> to vector<2x64xbf16>
    %cst_31 = arith.constant dense<0.000000e+00> : vector<2x256xf32>
    %148 = tpu.matmul %147, %1, %cst_31 {dimension_numbers = #tpu.dot_dimension_numbers<[1], [0], [0], [1], [0, 0, 1, 1], [], []>} : vector<2x64xbf16>, vector<64x256xbf16>, vector<2x256xf32> -> vector<2x256xf32>
    %149 = arith.addf %146, %148 : vector<2x256xf32>
    %150 = arith.negf %149 : vector<2x256xf32>
    %151 = math.exp %150 : vector<2x256xf32>
    %cst_32 = arith.constant 1.000000e+00 : f32
    %152 = vector.broadcast %cst_32 : f32 to vector<2x256xf32>
    %153 = arith.addf %152, %151 : vector<2x256xf32>
    %154 = arith.divf %152, %153 : vector<2x256xf32>
    %155 = math.tanh %149 : vector<2x256xf32>
    %156 = vector.extract_strided_slice %154 {offsets = [0, 64], sizes = [2, 64], strides = [1, 1]} : vector<2x256xf32> to vector<2x64xf32>
    %157 = arith.mulf %156, %142 : vector<2x64xf32>
    %158 = vector.extract_strided_slice %154 {offsets = [0, 0], sizes = [2, 64], strides = [1, 1]} : vector<2x256xf32> to vector<2x64xf32>
    %159 = vector.extract_strided_slice %155 {offsets = [0, 128], sizes = [2, 64], strides = [1, 1]} : vector<2x256xf32> to vector<2x64xf32>
    %160 = arith.mulf %158, %159 : vector<2x64xf32>
    %161 = arith.addf %157, %160 : vector<2x64xf32>
    %162 = vector.extract_strided_slice %154 {offsets = [0, 192], sizes = [2, 64], strides = [1, 1]} : vector<2x256xf32> to vector<2x64xf32>
    %163 = math.tanh %161 : vector<2x64xf32>
    %164 = arith.mulf %162, %163 : vector<2x64xf32>
    %165 = vector.extract_strided_slice %29 {offsets = [14, 0], sizes = [2, 256], strides = [1, 1]} : vector<16x256xf32> to vector<2x256xf32>
    %166 = arith.truncf %164 : vector<2x64xf32> to vector<2x64xbf16>
    %cst_33 = arith.constant dense<0.000000e+00> : vector<2x256xf32>
    %167 = tpu.matmul %166, %1, %cst_33 {dimension_numbers = #tpu.dot_dimension_numbers<[1], [0], [0], [1], [0, 0, 1, 1], [], []>} : vector<2x64xbf16>, vector<64x256xbf16>, vector<2x256xf32> -> vector<2x256xf32>
    %168 = arith.addf %165, %167 : vector<2x256xf32>
    %169 = arith.negf %168 : vector<2x256xf32>
    %170 = math.exp %169 : vector<2x256xf32>
    %cst_34 = arith.constant 1.000000e+00 : f32
    %171 = vector.broadcast %cst_34 : f32 to vector<2x256xf32>
    %172 = arith.addf %171, %170 : vector<2x256xf32>
    %173 = arith.divf %171, %172 : vector<2x256xf32>
    %174 = math.tanh %168 : vector<2x256xf32>
    %175 = vector.extract_strided_slice %173 {offsets = [0, 64], sizes = [2, 64], strides = [1, 1]} : vector<2x256xf32> to vector<2x64xf32>
    %176 = arith.mulf %175, %161 : vector<2x64xf32>
    %177 = vector.extract_strided_slice %173 {offsets = [0, 0], sizes = [2, 64], strides = [1, 1]} : vector<2x256xf32> to vector<2x64xf32>
    %178 = vector.extract_strided_slice %174 {offsets = [0, 128], sizes = [2, 64], strides = [1, 1]} : vector<2x256xf32> to vector<2x64xf32>
    %179 = arith.mulf %177, %178 : vector<2x64xf32>
    %180 = arith.addf %176, %179 : vector<2x64xf32>
    %181 = vector.extract_strided_slice %173 {offsets = [0, 192], sizes = [2, 64], strides = [1, 1]} : vector<2x256xf32> to vector<2x64xf32>
    %182 = math.tanh %180 : vector<2x64xf32>
    %183 = arith.mulf %181, %182 : vector<2x64xf32>
    %184 = arith.truncf %183 : vector<2x64xf32> to vector<2x64xbf16>
    %cst_35 = arith.constant dense<0.000000e+00> : vector<2x32xf32>
    %185 = tpu.matmul %184, %2, %cst_35 {dimension_numbers = #tpu.dot_dimension_numbers<[1], [0], [0], [1], [0, 0, 1, 1], [], []>} : vector<2x64xbf16>, vector<64x32xbf16>, vector<2x32xf32> -> vector<2x32xf32>
    %186 = vector.broadcast %10 : vector<1x32xf32> to vector<2x32xf32>
    %187 = arith.addf %185, %186 : vector<2x32xf32>
    %c0_36 = arith.constant 0 : index
    %c0_37 = arith.constant 0 : index
    %188 = vector.load %arg5[%c0_36, %c0_37] : memref<2x32xf32, #tpu.memory_space<vmem>>, vector<2x32xf32>
    tpu.vector_store %arg5[%c0_36, %c0_37], %187 {strides = array<i32>} : memref<2x32xf32, #tpu.memory_space<vmem>>, vector<2x32xf32>,
    %189 = vector.extract_strided_slice %187 {offsets = [0, 0], sizes = [2, 16], strides = [1, 1]} : vector<2x32xf32> to vector<2x16xf32>
    %190 = vector.extract_strided_slice %187 {offsets = [0, 16], sizes = [2, 16], strides = [1, 1]} : vector<2x32xf32> to vector<2x16xf32>
    %cst_38 = arith.constant 5.000000e-01 : f32
    %191 = vector.broadcast %cst_38 : f32 to vector<2x16xf32>
    %192 = arith.mulf %191, %190 : vector<2x16xf32>
    %193 = math.exp %192 : vector<2x16xf32>
    %194 = arith.mulf %12, %193 : vector<2x16xf32>
    %195 = arith.addf %189, %194 : vector<2x16xf32>
    %196 = arith.truncf %195 : vector<2x16xf32> to vector<2x16xbf16>
    %cst_39 = arith.constant dense<0.000000e+00> : vector<2x32xf32>
    %197 = tpu.matmul %196, %3, %cst_39 {dimension_numbers = #tpu.dot_dimension_numbers<[1], [0], [0], [1], [0, 0, 1, 1], [], []>} : vector<2x16xbf16>, vector<16x32xbf16>, vector<2x32xf32> -> vector<2x32xf32>
    %198 = vector.broadcast %11 : vector<1x32xf32> to vector<2x32xf32>
    %199 = arith.addf %197, %198 : vector<2x32xf32>
    %200 = arith.truncf %199 : vector<2x32xf32> to vector<2x32xbf16>
    %cst_40 = arith.constant dense<0.000000e+00> : vector<2x128xf32>
    %201 = tpu.matmul %200, %4, %cst_40 {dimension_numbers = #tpu.dot_dimension_numbers<[1], [0], [0], [1], [0, 0, 1, 1], [], []>} : vector<2x32xbf16>, vector<32x128xbf16>, vector<2x128xf32> -> vector<2x128xf32>
    %202 = vector.broadcast %8 : vector<1x128xf32> to vector<2x128xf32>
    %203 = arith.addf %201, %202 : vector<2x128xf32>
    %cst_41 = arith.constant 0.000000e+00 : f32
    %204 = vector.broadcast %cst_41 : f32 to vector<2x32xf32>
    %cst_42 = arith.constant 0.000000e+00 : f32
    %205 = vector.broadcast %cst_42 : f32 to vector<2x32xf32>
    %206 = arith.truncf %204 : vector<2x32xf32> to vector<2x32xbf16>
    %cst_43 = arith.constant dense<0.000000e+00> : vector<2x128xf32>
    %207 = tpu.matmul %206, %5, %cst_43 {dimension_numbers = #tpu.dot_dimension_numbers<[1], [0], [0], [1], [0, 0, 1, 1], [], []>} : vector<2x32xbf16>, vector<32x128xbf16>, vector<2x128xf32> -> vector<2x128xf32>
    %208 = arith.addf %203, %207 : vector<2x128xf32>
    %209 = arith.negf %208 : vector<2x128xf32>
    %210 = math.exp %209 : vector<2x128xf32>
    %cst_44 = arith.constant 1.000000e+00 : f32
    %211 = vector.broadcast %cst_44 : f32 to vector<2x128xf32>
    %212 = arith.addf %211, %210 : vector<2x128xf32>
    %213 = arith.divf %211, %212 : vector<2x128xf32>
    %214 = math.tanh %208 : vector<2x128xf32>
    %215 = vector.extract_strided_slice %213 {offsets = [0, 32], sizes = [2, 32], strides = [1, 1]} : vector<2x128xf32> to vector<2x32xf32>
    %216 = arith.mulf %215, %205 : vector<2x32xf32>
    %217 = vector.extract_strided_slice %213 {offsets = [0, 0], sizes = [2, 32], strides = [1, 1]} : vector<2x128xf32> to vector<2x32xf32>
    %218 = vector.extract_strided_slice %214 {offsets = [0, 64], sizes = [2, 32], strides = [1, 1]} : vector<2x128xf32> to vector<2x32xf32>
    %219 = arith.mulf %217, %218 : vector<2x32xf32>
    %220 = arith.addf %216, %219 : vector<2x32xf32>
    %221 = vector.extract_strided_slice %213 {offsets = [0, 96], sizes = [2, 32], strides = [1, 1]} : vector<2x128xf32> to vector<2x32xf32>
    %222 = math.tanh %220 : vector<2x32xf32>
    %223 = arith.mulf %221, %222 : vector<2x32xf32>
    %c0_45 = arith.constant 0 : index
    %c0_46 = arith.constant 0 : index
    %224 = vector.load %arg6[%c0_45, %c0_46] : memref<16x32xf32, #tpu.memory_space<vmem>>, vector<2x32xf32>
    tpu.vector_store %arg6[%c0_45, %c0_46], %223 {strides = array<i32>} : memref<16x32xf32, #tpu.memory_space<vmem>>, vector<2x32xf32>,
    %225 = arith.truncf %223 : vector<2x32xf32> to vector<2x32xbf16>
    %cst_47 = arith.constant dense<0.000000e+00> : vector<2x128xf32>
    %226 = tpu.matmul %225, %5, %cst_47 {dimension_numbers = #tpu.dot_dimension_numbers<[1], [0], [0], [1], [0, 0, 1, 1], [], []>} : vector<2x32xbf16>, vector<32x128xbf16>, vector<2x128xf32> -> vector<2x128xf32>
    %227 = arith.addf %203, %226 : vector<2x128xf32>
    %228 = arith.negf %227 : vector<2x128xf32>
    %229 = math.exp %228 : vector<2x128xf32>
    %cst_48 = arith.constant 1.000000e+00 : f32
    %230 = vector.broadcast %cst_48 : f32 to vector<2x128xf32>
    %231 = arith.addf %230, %229 : vector<2x128xf32>
    %232 = arith.divf %230, %231 : vector<2x128xf32>
    %233 = math.tanh %227 : vector<2x128xf32>
    %234 = vector.extract_strided_slice %232 {offsets = [0, 32], sizes = [2, 32], strides = [1, 1]} : vector<2x128xf32> to vector<2x32xf32>
    %235 = arith.mulf %234, %220 : vector<2x32xf32>
    %236 = vector.extract_strided_slice %232 {offsets = [0, 0], sizes = [2, 32], strides = [1, 1]} : vector<2x128xf32> to vector<2x32xf32>
    %237 = vector.extract_strided_slice %233 {offsets = [0, 64], sizes = [2, 32], strides = [1, 1]} : vector<2x128xf32> to vector<2x32xf32>
    %238 = arith.mulf %236, %237 : vector<2x32xf32>
    %239 = arith.addf %235, %238 : vector<2x32xf32>
    %240 = vector.extract_strided_slice %232 {offsets = [0, 96], sizes = [2, 32], strides = [1, 1]} : vector<2x128xf32> to vector<2x32xf32>
    %241 = math.tanh %239 : vector<2x32xf32>
    %242 = arith.mulf %240, %241 : vector<2x32xf32>
    %c2_49 = arith.constant 2 : index
    %c0_50 = arith.constant 0 : index
    %243 = vector.load %arg6[%c2_49, %c0_50] : memref<16x32xf32, #tpu.memory_space<vmem>>, vector<2x32xf32>
    tpu.vector_store %arg6[%c2_49, %c0_50], %242 {strides = array<i32>} : memref<16x32xf32, #tpu.memory_space<vmem>>, vector<2x32xf32>,
    %244 = arith.truncf %242 : vector<2x32xf32> to vector<2x32xbf16>
    %cst_51 = arith.constant dense<0.000000e+00> : vector<2x128xf32>
    %245 = tpu.matmul %244, %5, %cst_51 {dimension_numbers = #tpu.dot_dimension_numbers<[1], [0], [0], [1], [0, 0, 1, 1], [], []>} : vector<2x32xbf16>, vector<32x128xbf16>, vector<2x128xf32> -> vector<2x128xf32>
    %246 = arith.addf %203, %245 : vector<2x128xf32>
    %247 = arith.negf %246 : vector<2x128xf32>
    %248 = math.exp %247 : vector<2x128xf32>
    %cst_52 = arith.constant 1.000000e+00 : f32
    %249 = vector.broadcast %cst_52 : f32 to vector<2x128xf32>
    %250 = arith.addf %249, %248 : vector<2x128xf32>
    %251 = arith.divf %249, %250 : vector<2x128xf32>
    %252 = math.tanh %246 : vector<2x128xf32>
    %253 = vector.extract_strided_slice %251 {offsets = [0, 32], sizes = [2, 32], strides = [1, 1]} : vector<2x128xf32> to vector<2x32xf32>
    %254 = arith.mulf %253, %239 : vector<2x32xf32>
    %255 = vector.extract_strided_slice %251 {offsets = [0, 0], sizes = [2, 32], strides = [1, 1]} : vector<2x128xf32> to vector<2x32xf32>
    %256 = vector.extract_strided_slice %252 {offsets = [0, 64], sizes = [2, 32], strides = [1, 1]} : vector<2x128xf32> to vector<2x32xf32>
    %257 = arith.mulf %255, %256 : vector<2x32xf32>
    %258 = arith.addf %254, %257 : vector<2x32xf32>
    %259 = vector.extract_strided_slice %251 {offsets = [0, 96], sizes = [2, 32], strides = [1, 1]} : vector<2x128xf32> to vector<2x32xf32>
    %260 = math.tanh %258 : vector<2x32xf32>
    %261 = arith.mulf %259, %260 : vector<2x32xf32>
    %c4_53 = arith.constant 4 : index
    %c0_54 = arith.constant 0 : index
    %262 = vector.load %arg6[%c4_53, %c0_54] : memref<16x32xf32, #tpu.memory_space<vmem>>, vector<2x32xf32>
    tpu.vector_store %arg6[%c4_53, %c0_54], %261 {strides = array<i32>} : memref<16x32xf32, #tpu.memory_space<vmem>>, vector<2x32xf32>,
    %263 = arith.truncf %261 : vector<2x32xf32> to vector<2x32xbf16>
    %cst_55 = arith.constant dense<0.000000e+00> : vector<2x128xf32>
    %264 = tpu.matmul %263, %5, %cst_55 {dimension_numbers = #tpu.dot_dimension_numbers<[1], [0], [0], [1], [0, 0, 1, 1], [], []>} : vector<2x32xbf16>, vector<32x128xbf16>, vector<2x128xf32> -> vector<2x128xf32>
    %265 = arith.addf %203, %264 : vector<2x128xf32>
    %266 = arith.negf %265 : vector<2x128xf32>
    %267 = math.exp %266 : vector<2x128xf32>
    %cst_56 = arith.constant 1.000000e+00 : f32
    %268 = vector.broadcast %cst_56 : f32 to vector<2x128xf32>
    %269 = arith.addf %268, %267 : vector<2x128xf32>
    %270 = arith.divf %268, %269 : vector<2x128xf32>
    %271 = math.tanh %265 : vector<2x128xf32>
    %272 = vector.extract_strided_slice %270 {offsets = [0, 32], sizes = [2, 32], strides = [1, 1]} : vector<2x128xf32> to vector<2x32xf32>
    %273 = arith.mulf %272, %258 : vector<2x32xf32>
    %274 = vector.extract_strided_slice %270 {offsets = [0, 0], sizes = [2, 32], strides = [1, 1]} : vector<2x128xf32> to vector<2x32xf32>
    %275 = vector.extract_strided_slice %271 {offsets = [0, 64], sizes = [2, 32], strides = [1, 1]} : vector<2x128xf32> to vector<2x32xf32>
    %276 = arith.mulf %274, %275 : vector<2x32xf32>
    %277 = arith.addf %273, %276 : vector<2x32xf32>
    %278 = vector.extract_strided_slice %270 {offsets = [0, 96], sizes = [2, 32], strides = [1, 1]} : vector<2x128xf32> to vector<2x32xf32>
    %279 = math.tanh %277 : vector<2x32xf32>
    %280 = arith.mulf %278, %279 : vector<2x32xf32>
    %c6 = arith.constant 6 : index
    %c0_57 = arith.constant 0 : index
    %281 = vector.load %arg6[%c6, %c0_57] : memref<16x32xf32, #tpu.memory_space<vmem>>, vector<2x32xf32>
    tpu.vector_store %arg6[%c6, %c0_57], %280 {strides = array<i32>} : memref<16x32xf32, #tpu.memory_space<vmem>>, vector<2x32xf32>,
    %282 = arith.truncf %280 : vector<2x32xf32> to vector<2x32xbf16>
    %cst_58 = arith.constant dense<0.000000e+00> : vector<2x128xf32>
    %283 = tpu.matmul %282, %5, %cst_58 {dimension_numbers = #tpu.dot_dimension_numbers<[1], [0], [0], [1], [0, 0, 1, 1], [], []>} : vector<2x32xbf16>, vector<32x128xbf16>, vector<2x128xf32> -> vector<2x128xf32>
    %284 = arith.addf %203, %283 : vector<2x128xf32>
    %285 = arith.negf %284 : vector<2x128xf32>
    %286 = math.exp %285 : vector<2x128xf32>
    %cst_59 = arith.constant 1.000000e+00 : f32
    %287 = vector.broadcast %cst_59 : f32 to vector<2x128xf32>
    %288 = arith.addf %287, %286 : vector<2x128xf32>
    %289 = arith.divf %287, %288 : vector<2x128xf32>
    %290 = math.tanh %284 : vector<2x128xf32>
    %291 = vector.extract_strided_slice %289 {offsets = [0, 32], sizes = [2, 32], strides = [1, 1]} : vector<2x128xf32> to vector<2x32xf32>
    %292 = arith.mulf %291, %277 : vector<2x32xf32>
    %293 = vector.extract_strided_slice %289 {offsets = [0, 0], sizes = [2, 32], strides = [1, 1]} : vector<2x128xf32> to vector<2x32xf32>
    %294 = vector.extract_strided_slice %290 {offsets = [0, 64], sizes = [2, 32], strides = [1, 1]} : vector<2x128xf32> to vector<2x32xf32>
    %295 = arith.mulf %293, %294 : vector<2x32xf32>
    %296 = arith.addf %292, %295 : vector<2x32xf32>
    %297 = vector.extract_strided_slice %289 {offsets = [0, 96], sizes = [2, 32], strides = [1, 1]} : vector<2x128xf32> to vector<2x32xf32>
    %298 = math.tanh %296 : vector<2x32xf32>
    %299 = arith.mulf %297, %298 : vector<2x32xf32>
    %c8 = arith.constant 8 : index
    %c0_60 = arith.constant 0 : index
    %300 = vector.load %arg6[%c8, %c0_60] : memref<16x32xf32, #tpu.memory_space<vmem>>, vector<2x32xf32>
    tpu.vector_store %arg6[%c8, %c0_60], %299 {strides = array<i32>} : memref<16x32xf32, #tpu.memory_space<vmem>>, vector<2x32xf32>,
    %301 = arith.truncf %299 : vector<2x32xf32> to vector<2x32xbf16>
    %cst_61 = arith.constant dense<0.000000e+00> : vector<2x128xf32>
    %302 = tpu.matmul %301, %5, %cst_61 {dimension_numbers = #tpu.dot_dimension_numbers<[1], [0], [0], [1], [0, 0, 1, 1], [], []>} : vector<2x32xbf16>, vector<32x128xbf16>, vector<2x128xf32> -> vector<2x128xf32>
    %303 = arith.addf %203, %302 : vector<2x128xf32>
    %304 = arith.negf %303 : vector<2x128xf32>
    %305 = math.exp %304 : vector<2x128xf32>
    %cst_62 = arith.constant 1.000000e+00 : f32
    %306 = vector.broadcast %cst_62 : f32 to vector<2x128xf32>
    %307 = arith.addf %306, %305 : vector<2x128xf32>
    %308 = arith.divf %306, %307 : vector<2x128xf32>
    %309 = math.tanh %303 : vector<2x128xf32>
    %310 = vector.extract_strided_slice %308 {offsets = [0, 32], sizes = [2, 32], strides = [1, 1]} : vector<2x128xf32> to vector<2x32xf32>
    %311 = arith.mulf %310, %296 : vector<2x32xf32>
    %312 = vector.extract_strided_slice %308 {offsets = [0, 0], sizes = [2, 32], strides = [1, 1]} : vector<2x128xf32> to vector<2x32xf32>
    %313 = vector.extract_strided_slice %309 {offsets = [0, 64], sizes = [2, 32], strides = [1, 1]} : vector<2x128xf32> to vector<2x32xf32>
    %314 = arith.mulf %312, %313 : vector<2x32xf32>
    %315 = arith.addf %311, %314 : vector<2x32xf32>
    %316 = vector.extract_strided_slice %308 {offsets = [0, 96], sizes = [2, 32], strides = [1, 1]} : vector<2x128xf32> to vector<2x32xf32>
    %317 = math.tanh %315 : vector<2x32xf32>
    %318 = arith.mulf %316, %317 : vector<2x32xf32>
    %c10 = arith.constant 10 : index
    %c0_63 = arith.constant 0 : index
    %319 = vector.load %arg6[%c10, %c0_63] : memref<16x32xf32, #tpu.memory_space<vmem>>, vector<2x32xf32>
    tpu.vector_store %arg6[%c10, %c0_63], %318 {strides = array<i32>} : memref<16x32xf32, #tpu.memory_space<vmem>>, vector<2x32xf32>,
    %320 = arith.truncf %318 : vector<2x32xf32> to vector<2x32xbf16>
    %cst_64 = arith.constant dense<0.000000e+00> : vector<2x128xf32>
    %321 = tpu.matmul %320, %5, %cst_64 {dimension_numbers = #tpu.dot_dimension_numbers<[1], [0], [0], [1], [0, 0, 1, 1], [], []>} : vector<2x32xbf16>, vector<32x128xbf16>, vector<2x128xf32> -> vector<2x128xf32>
    %322 = arith.addf %203, %321 : vector<2x128xf32>
    %323 = arith.negf %322 : vector<2x128xf32>
    %324 = math.exp %323 : vector<2x128xf32>
    %cst_65 = arith.constant 1.000000e+00 : f32
    %325 = vector.broadcast %cst_65 : f32 to vector<2x128xf32>
    %326 = arith.addf %325, %324 : vector<2x128xf32>
    %327 = arith.divf %325, %326 : vector<2x128xf32>
    %328 = math.tanh %322 : vector<2x128xf32>
    %329 = vector.extract_strided_slice %327 {offsets = [0, 32], sizes = [2, 32], strides = [1, 1]} : vector<2x128xf32> to vector<2x32xf32>
    %330 = arith.mulf %329, %315 : vector<2x32xf32>
    %331 = vector.extract_strided_slice %327 {offsets = [0, 0], sizes = [2, 32], strides = [1, 1]} : vector<2x128xf32> to vector<2x32xf32>
    %332 = vector.extract_strided_slice %328 {offsets = [0, 64], sizes = [2, 32], strides = [1, 1]} : vector<2x128xf32> to vector<2x32xf32>
    %333 = arith.mulf %331, %332 : vector<2x32xf32>
    %334 = arith.addf %330, %333 : vector<2x32xf32>
    %335 = vector.extract_strided_slice %327 {offsets = [0, 96], sizes = [2, 32], strides = [1, 1]} : vector<2x128xf32> to vector<2x32xf32>
    %336 = math.tanh %334 : vector<2x32xf32>
    %337 = arith.mulf %335, %336 : vector<2x32xf32>
    %c12 = arith.constant 12 : index
    %c0_66 = arith.constant 0 : index
    %338 = vector.load %arg6[%c12, %c0_66] : memref<16x32xf32, #tpu.memory_space<vmem>>, vector<2x32xf32>
    tpu.vector_store %arg6[%c12, %c0_66], %337 {strides = array<i32>} : memref<16x32xf32, #tpu.memory_space<vmem>>, vector<2x32xf32>,
    %339 = arith.truncf %337 : vector<2x32xf32> to vector<2x32xbf16>
    %cst_67 = arith.constant dense<0.000000e+00> : vector<2x128xf32>
    %340 = tpu.matmul %339, %5, %cst_67 {dimension_numbers = #tpu.dot_dimension_numbers<[1], [0], [0], [1], [0, 0, 1, 1], [], []>} : vector<2x32xbf16>, vector<32x128xbf16>, vector<2x128xf32> -> vector<2x128xf32>
    %341 = arith.addf %203, %340 : vector<2x128xf32>
    %342 = arith.negf %341 : vector<2x128xf32>
    %343 = math.exp %342 : vector<2x128xf32>
    %cst_68 = arith.constant 1.000000e+00 : f32
    %344 = vector.broadcast %cst_68 : f32 to vector<2x128xf32>
    %345 = arith.addf %344, %343 : vector<2x128xf32>
    %346 = arith.divf %344, %345 : vector<2x128xf32>
    %347 = math.tanh %341 : vector<2x128xf32>
    %348 = vector.extract_strided_slice %346 {offsets = [0, 32], sizes = [2, 32], strides = [1, 1]} : vector<2x128xf32> to vector<2x32xf32>
    %349 = arith.mulf %348, %334 : vector<2x32xf32>
    %350 = vector.extract_strided_slice %346 {offsets = [0, 0], sizes = [2, 32], strides = [1, 1]} : vector<2x128xf32> to vector<2x32xf32>
    %351 = vector.extract_strided_slice %347 {offsets = [0, 64], sizes = [2, 32], strides = [1, 1]} : vector<2x128xf32> to vector<2x32xf32>
    %352 = arith.mulf %350, %351 : vector<2x32xf32>
    %353 = arith.addf %349, %352 : vector<2x32xf32>
    %354 = vector.extract_strided_slice %346 {offsets = [0, 96], sizes = [2, 32], strides = [1, 1]} : vector<2x128xf32> to vector<2x32xf32>
    %355 = math.tanh %353 : vector<2x32xf32>
    %356 = arith.mulf %354, %355 : vector<2x32xf32>
    %c14 = arith.constant 14 : index
    %c0_69 = arith.constant 0 : index
    %357 = vector.load %arg6[%c14, %c0_69] : memref<16x32xf32, #tpu.memory_space<vmem>>, vector<2x32xf32>
    tpu.vector_store %arg6[%c14, %c0_69], %356 {strides = array<i32>} : memref<16x32xf32, #tpu.memory_space<vmem>>, vector<2x32xf32>,
    %c0_70 = arith.constant 0 : index
    %c0_71 = arith.constant 0 : index
    %358 = vector.load %arg6[%c0_70, %c0_71] : memref<16x32xf32, #tpu.memory_space<vmem>>, vector<16x32xf32>
    %359 = arith.truncf %358 : vector<16x32xf32> to vector<16x32xbf16>
    %cst_72 = arith.constant dense<0.000000e+00> : vector<16x128xf32>
    %360 = tpu.matmul %359, %6, %cst_72 {dimension_numbers = #tpu.dot_dimension_numbers<[1], [0], [0], [1], [0, 0, 1, 1], [], []>} : vector<16x32xbf16>, vector<32x128xbf16>, vector<16x128xf32> -> vector<16x128xf32>
    %361 = vector.broadcast %9 : vector<1x128xf32> to vector<16x128xf32>
    %362 = arith.addf %360, %361 : vector<16x128xf32>
    %c0_73 = arith.constant 0 : index
    %c0_74 = arith.constant 0 : index
    %363 = vector.load %arg4[%c0_73, %c0_74] : memref<16x128xf32, #tpu.memory_space<vmem>>, vector<16x128xf32>
    tpu.vector_store %arg4[%c0_73, %c0_74], %362 {strides = array<i32>} : memref<16x128xf32, #tpu.memory_space<vmem>>, vector<16x128xf32>,
    return
  }
}

</mosaic_0001>

<bundles_post_ra>
// kernel: vae_forward.1
= control target key start
LH: loop header
LB: loop body
LE: loop exit
PB: predicated region body
PF: predicated region fallthrough
CT: control target
= control target key end

     0   :  { %11 = vsyncpa [#allocation4], 0  ;;  %s2220_s18 = smov [#allocation3]   ;;  %s2619_s0 = inlined_call_operand.vmem [shape: s32[16,2], index: 0, kind: input, shape index: {}]   ;;  %s2620_s1 = inlined_call_operand.vmem [shape: f32[2,16], index: 1, kind: input, shape index: {}]   ;;  %s2621_s2 = inlined_call_operand.hbm [shape: bf16[304,256], index: 2, kind: input, shape index: {}]   ;;  %s2622_s3 = inlined_call_operand.vmem [shape: f32[8,256], index: 3, kind: input, shape index: {}]   ;;  %s2623_s4 = inlined_call_operand.vmem [shape: f32[16,128], index: 4, kind: output, shape index: {0}]   ;;  %s2624_s5 = inlined_call_operand.vmem [shape: f32[2,32], index: 5, kind: output, shape index: {1}]  }
   0x1   :  { %s21_s19 = sshll.u32 %s2220_s18, 4  ;;  %s2196_s22 = scalar_lea.hbm %s2621_s2, 4864  ;;  %s22_s19 = int_to_ptr.vmem [resolvable:$true] %s21_s19 }
   0x2   :  { %p2197_p0 = scmp.ne.s32.totalorder %s2621_s2, %s2196_s22  ;;  %p2200_p1 = scmp.lt.u32.totalorder %s2196_s22, %s2621_s2 }
   0x4   :  { %p2202_p2 = pnand %p2200_p1, %p2197_p0 }
   0x6   :  { %2205 = shalt.err (!%p2202_p2)
}
   0x7   :  { %s2206_s27 = scalar_lea.vmem %s22_s19, 4864  ;;  %p2211_p4 = scmp.lt.s32.totalorder %s22_s19, %s22_s19 }
   0x8   :  { %p2207_p3 = scmp.ne.s32.totalorder %s22_s19, %s2206_s27  ;;  %p2212_p5 = scmp.lt.s32.totalorder %s2206_s27, %s2206_s27 }
   0xa   :  { %p2213_p6 = por %p2212_p5, %p2211_p4 }
   0xc   :  { %p2214_p7 = pnand %p2213_p6, %p2207_p3 }
   0xe   :  { %2217 = shalt.err (!%p2214_p7)
}
   0xf   :  { %s2221_s28 = smov 128   ;;  %s2222_s29 = smov 8  }
  0x10   :  { %27 = dma.hbm_to_vmem [thread:$0]  %s2621_s2, 4864, %s22_s19, [#allocation4], %s2221_s28, %s2221_s28, %s2222_s29  }
  0x11   :  { %2218 = dma.done.wait [#allocation4], 4864  }
  0x12   :  { %2219 = vsyncadd [#allocation4], 4294962432  ;;  %v2223_v0 = vmov 1   ;;  %v2224_v1 = vmov 0   ;;  %v78_v2 = vld [vmem:[%s2619_s0] sm:$0xff]  ;;  %v79_v3 = vld [vmem:[%s2619_s0 + $0x8] sm:$0xff]  ;;  %v80_v17 = vlaneseq }
  0x13   :  { %1992 = vset.pattern.permute.xlu0 %v2223_v0  ;;  %1993 = vset.pattern.permute.xlu1 %v2224_v1  ;;  %v2281_v4 = vld [vmem:[#allocation3 + $0x44] ss:$8 sps:$4 sm:$0xff]   ;;  %v2283_v6 = vld [vmem:[#allocation3 + $0x40] ss:$8 sps:$4 sm:$0xff]   ;;  %v2285_v8 = vld [vmem:[#allocation3 + $0x54] ss:$8 sps:$4 sm:$0xff]  }
  0x14   :  { %291 = vmatprep.mubr.bf16.mxu1 %v2224_v1  ;;  %205 = vmatprep.mubr.bf16.mxu0 %v2224_v1  ;;  %v2001_v5 = vld [vmem:[#allocation3 + $0x4] ss:$8 sps:$4 sm:$0xff]   ;;  %v2004_v7 = vld [vmem:[#allocation3] ss:$8 sps:$4 sm:$0xff]   ;;  %v2007_v9 = vld [vmem:[#allocation3 + $0x14] ss:$8 sps:$4 sm:$0xff]  }
  0x15   :  { %95 = vperm.xlu0 %1992, %v78_v2   ;;  %83 = vperm.xlu1 %1993, %v78_v2   ;;  %v2289_v10 = vld [vmem:[#allocation3 + $0x50] ss:$8 sps:$4 sm:$0xff]   ;;  %v2291_v12 = vld [vmem:[#allocation3 + $0x64] ss:$8 sps:$4 sm:$0xff]   ;;  %v2294_v14 = vld [vmem:[#allocation3 + $0x60] ss:$8 sps:$4 sm:$0xff]  }
  0x16   :  { %259 = vmatprep.subr.bf16.mxu1 %v2281_v4  ;;  %173 = vmatprep.subr.bf16.mxu0 %v2001_v5  ;;  %v2010_v11 = vld [vmem:[#allocation3 + $0x10] ss:$8 sps:$4 sm:$0xff]   ;;  %v2013_v13 = vld [vmem:[#allocation3 + $0x24] ss:$8 sps:$4 sm:$0xff]   ;;  %v2016_v15 = vld [vmem:[#allocation3 + $0x20] ss:$8 sps:$4 sm:$0xff]  }
  0x17   :  { %260 = vmatpush1.bf16.msra.mxu1 %v2283_v6  ;;  %174 = vmatpush1.bf16.msra.mxu0 %v2004_v7  ;;  %v2299_v16 = vld [vmem:[#allocation3 + $0x74] ss:$8 sps:$4 sm:$0xff]   ;;  %v2301_v19 = vld [vmem:[#allocation3 + $0x70] ss:$8 sps:$4 sm:$0xff]   ;;  %v81_v21 = vand.u32 127, %v80_v17  ;;  %v2225_v24 = vmov 0.0  }
  0x18   :  { %261 = vmatprep.subr.bf16.mxu1 %v2285_v8  ;;  %175 = vmatprep.subr.bf16.mxu0 %v2007_v9  ;;  %v2019_v18 = vld [vmem:[#allocation3 + $0x34] ss:$8 sps:$4 sm:$0xff]   ;;  %v2022_v20 = vld [vmem:[#allocation3 + $0x30] ss:$8 sps:$4 sm:$0xff]   ;;  %s2226_s0 = smov 32   ;;  %vm114_vm4 = vcmask 261120  }
  0x19   :  { %98 = vperm.xlu0 %1992, %v79_v3   ;;  %86 = vperm.xlu1 %1993, %v79_v3   ;;  %vm169_vm5 = vcmask 523264   ;;  %v120_v42 = vshrl.u32 %v80_v17, 7  ;;  %v72_v44 = vld [vmem:[%s2622_s3] ss:$8 sm:$0x3]  ;;  %s2227_s12 = smov 64  }
  0x1a   :  { %vm2228_vm6 = vmmov 0   ;;  %vm962_vm7 = vcmask 254976   ;;  %s2229_s17 = smov 112   ;;  %vm980_vm8 = vcmask 130048  }
  0x1b   :  { %262 = vmatpush1.bf16.msra.mxu1 %v2289_v10  ;;  %176 = vmatpush1.bf16.msra.mxu0 %v2010_v11  ;;  %v121_v43 = vsub.s32 0, %v120_v42  ;;  %v125_v46 = vsub.s32 1, %v120_v42 }
  0x1c   :  { %263 = vmatprep.subr.bf16.mxu1 %v2291_v12  ;;  %177 = vmatprep.subr.bf16.mxu0 %v2013_v13 }
  0x1d   :  { %v122_v45 = vrot.slane %v72_v44, %v121_v43  ;;  %v126_v50 = vrot.slane %v72_v44, %v125_v46 }
  0x1f   :  { %264 = vmatpush1.bf16.msra.mxu1 %v2294_v14  ;;  %178 = vmatpush1.bf16.msra.mxu0 %v2016_v15 }
  0x20   :  { %265 = vmatprep.subr.bf16.mxu1 %v2299_v16  ;;  %179 = vmatprep.subr.bf16.mxu0 %v2019_v18 }
  0x23   :  { %266 = vmatpush1.bf16.msra.mxu1 %v2301_v19  ;;  %180 = vmatpush1.bf16.msra.mxu0 %v2022_v20 }
  0x24   :  { %413 = vmatprep.subr.bf16.mxu1 %v2281_v4  ;;  %331 = vmatprep.subr.bf16.mxu0 %v2281_v4 }
  0x26   :  { %292 = vmatmul.mubr.bf16.vlgmr.msra.gmra.mrb[0].mxu1 %v2224_v1 }
  0x27   :  { %414 = vmatpush1.bf16.msra.mxu1 %v2283_v6  ;;  %445 = vmatprep.mubr.bf16.mxu1 %v2224_v1 }
  0x28   :  { %415 = vmatprep.subr.bf16.mxu1 %v2285_v8 }
  0x2b   :  { %416 = vmatpush1.bf16.msra.mxu1 %v2289_v10 }
  0x2c   :  { %417 = vmatprep.subr.bf16.mxu1 %v2291_v12 }
  0x2f   :  { %418 = vmatpush1.bf16.msra.mxu1 %v2294_v14 }
  0x30   :  { %419 = vmatprep.subr.bf16.mxu1 %v2299_v16 }
  0x33   :  { %420 = vmatpush1.bf16.msra.mxu1 %v2301_v19 }
  0x34   :  { %577 = vmatprep.subr.bf16.mxu1 %v2281_v4 }
  0x94   :  { %v96_v22 = vpop.permute.xlu0 %95  ;;  %v84_v28 = vpop.permute.xlu1 %83 }
  0x95   :  { %vm100_vm0 = vcmp.eq.s32.totalorder %v96_v22, %v81_v21  ;;  %vm88_vm2 = vcmp.eq.s32.totalorder %v84_v28, %v81_v21 }
  0x96   :  { %v1775_v25 = vsel %vm100_vm0, 1.0, %v2225_v24  ;;  %v1773_v33 = vsel %vm88_vm2, 1.0, %v2225_v24 }
  0x98   :  { %v99_v23 = vpop.permute.xlu0 %98  ;;  %v87_v29 = vpop.permute.xlu1 %86 }
  0x99   :  { %vm101_vm1 = vcmp.eq.s32.totalorder %v99_v23, %v81_v21  ;;  %vm89_vm3 = vcmp.eq.s32.totalorder %v87_v29, %v81_v21 }
  0x9a   :  { %v1776_v26 = vsel %vm101_vm1, 1.0, %v2225_v24  ;;  %v1774_v34 = vsel %vm89_vm3, 1.0, %v2225_v24 }
  0x9b   :  { %v1994_v27 = vpack.i.bf16 %v1776_v26, %v1775_v25 }
  0x9d   :  { %1995 = vrot.lane.b32.xlu0 %v1994_v27, %s2226_s0 }
  0xf9   :  { %v293_v38 = vpop.f32.mrb[0].mxu1 }
  0xfa   :  { %v295_v39 = vpop.f32.mrb[1].mxu1 }
  0xfb   :  { %v297_v40 = vpop.f32.mrb[2].mxu1 }
  0xfc   :  { %v298_v41 = vpop.f32.mrb[3].mxu1 }
 0x10f   :  { %v1996_v30 = vpop.permute.xlu0 %1995 }
 0x110   :  { %v1998_v31 = vunpack.i.h.bf16 %v1996_v30  ;;  %v1997_v32 = vunpack.i.l.bf16 %v1996_v30 }
 0x112   :  { %v116_v35 = vsel %vm114_vm4, %v1774_v34, %v1998_v31  ;;  %v115_v36 = vsel %vm114_vm4, %v1773_v33, %v1997_v32 }
 0x113   :  { %v117_v37 = vpack.c.bf16 %v116_v35, %v115_v36 }
 0x115   :  { %1785 = vmatmul.mubr.msk.bf16.vlgmr.msra.gmra.mrb[0].mxu0 %vm169_vm5, %v117_v37 }
 0x116   :  { %332 = vmatpush1.bf16.msra.mxu0 %v2283_v6  ;;  %363 = vmatprep.mubr.bf16.mxu0 %v2224_v1 }
 0x117   :  { %333 = vmatprep.subr.bf16.mxu0 %v2285_v8 }
 0x11a   :  { %334 = vmatpush1.bf16.msra.mxu0 %v2289_v10 }
 0x11b   :  { %335 = vmatprep.subr.bf16.mxu0 %v2291_v12 }
 0x11e   :  { %336 = vmatpush1.bf16.msra.mxu0 %v2294_v14 }
 0x11f   :  { %337 = vmatprep.subr.bf16.mxu0 %v2299_v16 }
 0x122   :  { %338 = vmatpush1.bf16.msra.mxu0 %v2301_v19 }
 0x123   :  { %495 = vmatprep.subr.bf16.mxu0 %v2281_v4 }
 0x1e8   :  { %v207_v47 = vpop.f32.mrb[0].mxu0 }
 0x1e9   :  { %v2337_v48 = vadd.f32 %v207_v47, %v122_v45  ;;  %v209_v49 = vpop.f32.mrb[1].mxu0 }
 0x1ea   :  { %v211_v51 = vpop.f32.mrb[2].mxu0  ;;  %v2344_v57 = vadd.f32 %v209_v49, %v126_v50 }
 0x1eb   :  { %v300_v52 = vadd.f32 %v293_v38, %v2337_v48  ;;  %v2340_v53 = vadd.f32 %v211_v51, %v122_v45  ;;  %v213_v54 = vpop.f32.mrb[3].mxu0 }
 0x1ec   :  { %v2342_v55 = vadd.f32 %v213_v54, %v126_v50  ;;  %v301_v58 = vadd.f32 %v295_v39, %v2344_v57 }
 0x1ed   :  { %v1794_v56 = vmul.f32 -1.442695, %v300_v52 }
 0x1ee   :  { %v1795_v0 = vmul.f32 -1.442695, %v301_v58 }
 0x1ef   :  { %2034 = vpow2.f32 %v1794_v56 }
 0x1f0   :  { %2036 = vtanh.f32 %v301_v58 }
 0x1f9   :  { %v2035_v59 = vpop.eup %2034 }
 0x1fa   :  { %v308_v60 = vadd.f32 1.0, %v2035_v59  ;;  %v2037_v61 = vpop.eup %2036 }
 0x1fc   :  { %2038 = vrcp.f32 %v308_v60 }
 0x1fd   :  { %2040 = vpow2.f32 %v1795_v0 }
 0x206   :  { %v2039_v62 = vpop.eup %2038 }
 0x207   :  { %v316_v63 = vmul.f32 %v2039_v62, %v2037_v61  ;;  %v2041_v2 = vpop.eup %2040  ;;  %v315_v5 = vmul.f32 0.0, %v2039_v62 }
 0x208   :  { %v309_v3 = vadd.f32 1.0, %v2041_v2 }
 0x209   :  { %318 = vrot.lane.b32.xlu1 %v316_v63, %s2227_s12 }
 0x20a   :  { %2042 = vrcp.f32 %v309_v3 }
 0x214   :  { %v2043_v11 = vpop.eup %2042 }
 0x27b   :  { %v319_v7 = vpop.permute.xlu1 %318 }
 0x27c   :  { %v321_v9 = vadd.f32 %v319_v7, %v315_v5 }
 0x27e   :  { %2044 = vtanh.f32 %v321_v9  ;;  %v394_v33 = vrot.slane %v321_v9, 6 }
 0x288   :  { %v2045_v13 = vpop.eup %2044 }
 0x289   :  { %v323_v15 = vmul.f32 %v2045_v13, %v2043_v11 }
 0x28b   :  { %v324_v17 = vpack.c.bf16 %v323_v15, %v323_v15 }
 0x28d   :  { %326 = vrot.lane.b32.xlu0 %v324_v17, %s2227_s12 }
 0x2ff   :  { %v327_v18 = vpop.permute.xlu0 %326 }
 0x300   :  { %1796 = vmatmul.mubr.msk.bf16.vlgmr.msra.gmra.mrb[4].mxu0 %vm169_vm5, %v327_v18 }
 0x301   :  { %496 = vmatpush1.bf16.msra.mxu0 %v2283_v6  ;;  %527 = vmatprep.mubr.bf16.mxu0 %v2224_v1 }
 0x302   :  { %497 = vmatprep.subr.bf16.mxu0 %v2285_v8 }
 0x305   :  { %498 = vmatpush1.bf16.msra.mxu0 %v2289_v10 }
 0x306   :  { %499 = vmatprep.subr.bf16.mxu0 %v2291_v12 }
 0x309   :  { %500 = vmatpush1.bf16.msra.mxu0 %v2294_v14 }
 0x30a   :  { %501 = vmatprep.subr.bf16.mxu0 %v2299_v16 }
 0x30d   :  { %502 = vmatpush1.bf16.msra.mxu0 %v2301_v19 }
 0x30e   :  { %652 = vmatprep.subr.bf16.mxu0 %v2281_v4 }
 0x3d3   :  { %v365_v20 = vpop.f32.mrb[4].mxu0 }
 0x3d4   :  { %v374_v21 = vrot.slane %v365_v20, 6  ;;  %v367_v22 = vpop.f32.mrb[5].mxu0 }
 0x3d5   :  { %v369_v23 = vpop.f32.mrb[6].mxu0  ;;  %v375_v28 = vrot.slane %v367_v22, 6 }
 0x3d6   :  { %v378_v25 = vadd.f32 %v374_v21, %v2337_v48  ;;  %v370_v26 = vpop.f32.mrb[7].mxu0 }
 0x3d7   :  { %v379_v29 = vadd.f32 %v375_v28, %v2344_v57 }
 0x3d8   :  { %v1797_v27 = vmul.f32 -1.442695, %v378_v25 }
 0x3d9   :  { %v1798_v37 = vmul.f32 -1.442695, %v379_v29 }
 0x3da   :  { %2046 = vpow2.f32 %v1797_v27 }
 0x3db   :  { %2048 = vtanh.f32 %v379_v29 }
 0x3e4   :  { %v2047_v30 = vpop.eup %2046 }
 0x3e5   :  { %v386_v31 = vadd.f32 1.0, %v2047_v30  ;;  %v2049_v32 = vpop.eup %2048 }
 0x3e7   :  { %2050 = vrcp.f32 %v386_v31 }
 0x3e8   :  { %2052 = vpow2.f32 %v1798_v37 }
 0x3f1   :  { %v2051_v34 = vpop.eup %2050 }
 0x3f2   :  { %v397_v35 = vmul.f32 %v2051_v34, %v2049_v32  ;;  %v396_v36 = vmul.f32 %v2051_v34, %v394_v33  ;;  %v2053_v38 = vpop.eup %2052 }
 0x3f3   :  { %v387_v39 = vadd.f32 1.0, %v2053_v38 }
 0x3f4   :  { %399 = vrot.lane.b32.xlu1 %v397_v35, %s2227_s12 }
 0x3f5   :  { %2054 = vrcp.f32 %v387_v39 }
 0x3ff   :  { %v2055_v42 = vpop.eup %2054 }
 0x466   :  { %v400_v40 = vpop.permute.xlu1 %399 }
 0x467   :  { %v402_v41 = vadd.f32 %v400_v40, %v396_v36 }
 0x469   :  { %2056 = vtanh.f32 %v402_v41  ;;  %v476_v0 = vrot.slane %v402_v41, 6 }
 0x473   :  { %v2057_v43 = vpop.eup %2056 }
 0x474   :  { %v404_v44 = vmul.f32 %v2057_v43, %v2055_v42 }
 0x476   :  { %v405_v45 = vpack.c.bf16 %v404_v44, %v404_v44 }
 0x478   :  { %v407_v46 = vrot.slane %v405_v45, 1 }
 0x47a   :  { %408 = vrot.lane.b32.xlu0 %v407_v46, %s2227_s12 }
 0x4ec   :  { %v409_v47 = vpop.permute.xlu0 %408 }
 0x4ed   :  { %1799 = vmatmul.mubr.msk.bf16.vlgmr.msra.gmra.mrb[4].mxu1 %vm169_vm5, %v409_v47 }
 0x4ee   :  { %578 = vmatpush1.bf16.msra.mxu1 %v2283_v6  ;;  %609 = vmatprep.mubr.bf16.mxu1 %v2224_v1 }
 0x4ef   :  { %579 = vmatprep.subr.bf16.mxu1 %v2285_v8 }
 0x4f2   :  { %580 = vmatpush1.bf16.msra.mxu1 %v2289_v10 }
 0x4f3   :  { %581 = vmatprep.subr.bf16.mxu1 %v2291_v12 }
 0x4f6   :  { %582 = vmatpush1.bf16.msra.mxu1 %v2294_v14 }
 0x4f7   :  { %583 = vmatprep.subr.bf16.mxu1 %v2299_v16 }
 0x4fa   :  { %584 = vmatpush1.bf16.msra.mxu1 %v2301_v19 }
 0x4fb   :  { %734 = vmatprep.subr.bf16.mxu1 %v2281_v4 }
 0x5c0   :  { %v447_v49 = vpop.f32.mrb[4].mxu1 }
 0x5c1   :  { %v456_v50 = vrot.slane %v447_v49, 4  ;;  %v449_v51 = vpop.f32.mrb[5].mxu1 }
 0x5c2   :  { %v451_v52 = vpop.f32.mrb[6].mxu1  ;;  %v457_v59 = vrot.slane %v449_v51, 4 }
 0x5c3   :  { %v460_v54 = vadd.f32 %v456_v50, %v2337_v48  ;;  %v452_v56 = vpop.f32.mrb[7].mxu1 }
 0x5c4   :  { %v461_v60 = vadd.f32 %v457_v59, %v2344_v57 }
 0x5c5   :  { %v1800_v58 = vmul.f32 -1.442695, %v460_v54 }
 0x5c6   :  { %v1801_v7 = vmul.f32 -1.442695, %v461_v60 }
 0x5c7   :  { %2058 = vpow2.f32 %v1800_v58 }
 0x5c8   :  { %2060 = vtanh.f32 %v461_v60 }
 0x5d1   :  { %v2059_v61 = vpop.eup %2058 }
 0x5d2   :  { %v468_v62 = vadd.f32 1.0, %v2059_v61  ;;  %v2061_v63 = vpop.eup %2060 }
 0x5d4   :  { %2062 = vrcp.f32 %v468_v62 }
 0x5d5   :  { %2064 = vpow2.f32 %v1801_v7 }
 0x5de   :  { %v2063_v2 = vpop.eup %2062 }
 0x5df   :  { %v479_v3 = vmul.f32 %v2063_v2, %v2061_v63  ;;  %v478_v5 = vmul.f32 %v2063_v2, %v476_v0  ;;  %v2065_v9 = vpop.eup %2064 }
 0x5e0   :  { %v469_v11 = vadd.f32 1.0, %v2065_v9 }
 0x5e1   :  { %481 = vrot.lane.b32.xlu1 %v479_v3, %s2227_s12 }
 0x5e2   :  { %2066 = vrcp.f32 %v469_v11 }
 0x5ec   :  { %v2067_v17 = vpop.eup %2066 }
 0x653   :  { %v482_v13 = vpop.permute.xlu1 %481 }
 0x654   :  { %v484_v15 = vadd.f32 %v482_v13, %v478_v5 }
 0x656   :  { %2068 = vtanh.f32 %v484_v15  ;;  %v558_v37 = vrot.slane %v484_v15, 6 }
 0x660   :  { %v2069_v18 = vpop.eup %2068 }
 0x661   :  { %v486_v20 = vmul.f32 %v2069_v18, %v2067_v17 }
 0x663   :  { %v487_v21 = vpack.c.bf16 %v486_v20, %v486_v20 }
 0x665   :  { %v489_v22 = vrot.slane %v487_v21, 2 }
 0x667   :  { %490 = vrot.lane.b32.xlu0 %v489_v22, %s2227_s12 }
 0x6d9   :  { %v491_v23 = vpop.permute.xlu0 %490 }
 0x6da   :  { %1802 = vmatmul.mubr.msk.bf16.vlgmr.msra.gmra.mrb[8].mxu0 %vm169_vm5, %v491_v23 }
 0x6db   :  { %653 = vmatpush1.bf16.msra.mxu0 %v2283_v6  ;;  %684 = vmatprep.mubr.bf16.mxu0 %v2224_v1 }
 0x6dc   :  { %654 = vmatprep.subr.bf16.mxu0 %v2285_v8 }
 0x6df   :  { %655 = vmatpush1.bf16.msra.mxu0 %v2289_v10 }
 0x6e0   :  { %656 = vmatprep.subr.bf16.mxu0 %v2291_v12 }
 0x6e3   :  { %657 = vmatpush1.bf16.msra.mxu0 %v2294_v14 }
 0x6e4   :  { %658 = vmatprep.subr.bf16.mxu0 %v2299_v16 }
 0x6e7   :  { %659 = vmatpush1.bf16.msra.mxu0 %v2301_v19 }
 0x6e8   :  { %816 = vmatprep.subr.bf16.mxu0 %v2281_v4 }
 0x7ad   :  { %v529_v25 = vpop.f32.mrb[8].mxu0 }
 0x7ae   :  { %v538_v26 = vrot.slane %v529_v25, 2  ;;  %v531_v27 = vpop.f32.mrb[9].mxu0 }
 0x7af   :  { %v533_v28 = vpop.f32.mrb[10].mxu0  ;;  %v539_v32 = vrot.slane %v531_v27, 2 }
 0x7b0   :  { %v542_v29 = vadd.f32 %v538_v26, %v2337_v48  ;;  %v534_v30 = vpop.f32.mrb[11].mxu0 }
 0x7b1   :  { %v543_v33 = vadd.f32 %v539_v32, %v2344_v57 }
 0x7b2   :  { %v1803_v31 = vmul.f32 -1.442695, %v542_v29 }
 0x7b3   :  { %v1804_v40 = vmul.f32 -1.442695, %v543_v33 }
 0x7b4   :  { %2070 = vpow2.f32 %v1803_v31 }
 0x7b5   :  { %2072 = vtanh.f32 %v543_v33 }
 0x7be   :  { %v2071_v34 = vpop.eup %2070 }
 0x7bf   :  { %v550_v35 = vadd.f32 1.0, %v2071_v34  ;;  %v2073_v36 = vpop.eup %2072 }
 0x7c1   :  { %2074 = vrcp.f32 %v550_v35 }
 0x7c2   :  { %2076 = vpow2.f32 %v1804_v40 }
 0x7cb   :  { %v2075_v38 = vpop.eup %2074 }
 0x7cc   :  { %v561_v4 = vmul.f32 %v2075_v38, %v2073_v36  ;;  %v560_v39 = vmul.f32 %v2075_v38, %v558_v37  ;;  %v2077_v48 = vpop.eup %2076 }
 0x7cd   :  { %v551_v41 = vadd.f32 1.0, %v2077_v48 }
 0x7ce   :  { %563 = vrot.lane.b32.xlu1 %v561_v4, %s2227_s12 }
 0x7cf   :  { %2078 = vrcp.f32 %v551_v41 }
 0x7d9   :  { %v2079_v57 = vpop.eup %2078 }
 0x840   :  { %v564_v42 = vpop.permute.xlu1 %563 }
 0x841   :  { %v566_v43 = vadd.f32 %v564_v42, %v560_v39 }
 0x843   :  { %2080 = vtanh.f32 %v566_v43  ;;  %v634_v63 = vrot.slane %v566_v43, 6 }
 0x84d   :  { %v2081_v44 = vpop.eup %2080 }
 0x84e   :  { %v568_v45 = vmul.f32 %v2081_v44, %v2079_v57 }
 0x850   :  { %v569_v46 = vpack.c.bf16 %v568_v45, %v568_v45 }
 0x852   :  { %v571_v47 = vrot.slane %v569_v46, 3 }
 0x854   :  { %572 = vrot.lane.b32.xlu0 %v571_v47, %s2227_s12 }
 0x8c6   :  { %v573_v49 = vpop.permute.xlu0 %572 }
 0x8c7   :  { %1805 = vmatmul.mubr.msk.bf16.vlgmr.msra.gmra.mrb[8].mxu1 %vm169_vm5, %v573_v49 }
 0x8c8   :  { %735 = vmatpush1.bf16.msra.mxu1 %v2283_v6  ;;  %766 = vmatprep.mubr.bf16.mxu1 %v2224_v1 }
 0x8c9   :  { %736 = vmatprep.subr.bf16.mxu1 %v2285_v8 }
 0x8cc   :  { %737 = vmatpush1.bf16.msra.mxu1 %v2289_v10 }
 0x8cd   :  { %738 = vmatprep.subr.bf16.mxu1 %v2291_v12 }
 0x8d0   :  { %739 = vmatpush1.bf16.msra.mxu1 %v2294_v14 }
 0x8d1   :  { %740 = vmatprep.subr.bf16.mxu1 %v2299_v16 }
 0x8d4   :  { %741 = vmatpush1.bf16.msra.mxu1 %v2301_v19 }
 0x8d5   :  { %1884 = vmatprep.subr.bf16.mxu1 %v2225_v24 }
 0x99a   :  { %v611_v50 = vpop.f32.mrb[8].mxu1 }
 0x99b   :  { %v618_v51 = vadd.f32 %v611_v50, %v2340_v53  ;;  %v613_v52 = vpop.f32.mrb[9].mxu1 }
 0x99c   :  { %v615_v54 = vpop.f32.mrb[10].mxu1  ;;  %v619_v59 = vadd.f32 %v613_v52, %v2342_v55 }
 0x99d   :  { %v1806_v56 = vmul.f32 -1.442695, %v618_v51  ;;  %v616_v58 = vpop.f32.mrb[11].mxu1 }
 0x99e   :  { %v1807_v5 = vmul.f32 -1.442695, %v619_v59 }
 0x99f   :  { %2082 = vpow2.f32 %v1806_v56 }
 0x9a0   :  { %2084 = vtanh.f32 %v619_v59 }
 0x9a9   :  { %v2083_v60 = vpop.eup %2082 }
 0x9aa   :  { %v626_v61 = vadd.f32 1.0, %v2083_v60  ;;  %v2085_v62 = vpop.eup %2084 }
 0x9ac   :  { %2086 = vrcp.f32 %v626_v61 }
 0x9ad   :  { %2088 = vpow2.f32 %v1807_v5 }
 0x9b6   :  { %v2087_v0 = vpop.eup %2086 }
 0x9b7   :  { %v637_v2 = vmul.f32 %v2087_v0, %v2085_v62  ;;  %v636_v3 = vmul.f32 %v2087_v0, %v634_v63  ;;  %v2089_v7 = vpop.eup %2088 }
 0x9b8   :  { %v627_v9 = vadd.f32 1.0, %v2089_v7 }
 0x9b9   :  { %639 = vrot.lane.b32.xlu1 %v637_v2, %s2227_s12 }
 0x9ba   :  { %2090 = vrcp.f32 %v627_v9 }
 0x9c4   :  { %v2091_v15 = vpop.eup %2090 }
 0xa2b   :  { %v640_v11 = vpop.permute.xlu1 %639 }
 0xa2c   :  { %v642_v13 = vadd.f32 %v640_v11, %v636_v3 }
 0xa2e   :  { %2092 = vtanh.f32 %v642_v13 }
 0xa38   :  { %v2093_v17 = vpop.eup %2092 }
 0xa39   :  { %v644_v18 = vmul.f32 %v2093_v17, %v2091_v15 }
 0xa3b   :  { %v645_v20 = vpack.c.bf16 %v644_v18, %v644_v18 }
 0xa3d   :  { %647 = vrot.lane.b32.xlu0 %v645_v20, %s2227_s12 }
 0xaaf   :  { %v648_v21 = vpop.permute.xlu0 %647 }
 0xab0   :  { %1808 = vmatmul.mubr.msk.bf16.vlgmr.msra.gmra.mrb[12].mxu0 %vm169_vm5, %v648_v21 }
 0xab1   :  { %817 = vmatpush1.bf16.msra.mxu0 %v2283_v6  ;;  %848 = vmatprep.mubr.bf16.mxu0 %v2224_v1 }
 0xab2   :  { %818 = vmatprep.subr.bf16.mxu0 %v2285_v8 }
 0xab5   :  { %819 = vmatpush1.bf16.msra.mxu0 %v2289_v10 }
 0xab6   :  { %820 = vmatprep.subr.bf16.mxu0 %v2291_v12 }
 0xab9   :  { %821 = vmatpush1.bf16.msra.mxu0 %v2294_v14 }
 0xaba   :  { %822 = vmatprep.subr.bf16.mxu0 %v2299_v16 }
 0xabd   :  { %823 = vmatpush1.bf16.msra.mxu0 %v2301_v19  ;;  %v715_v19 = vrot.slane %v642_v13, 6 }
 0xabe   :  { %1896 = vmatprep.subr.bf16.mxu0 %v2225_v24 }
 0xb83   :  { %v686_v22 = vpop.f32.mrb[12].mxu0 }
 0xb84   :  { %v695_v23 = vrot.slane %v686_v22, 6  ;;  %v688_v25 = vpop.f32.mrb[13].mxu0 }
 0xb85   :  { %v690_v6 = vpop.f32.mrb[14].mxu0  ;;  %v696_v10 = vrot.slane %v688_v25, 6 }
 0xb86   :  { %v699_v26 = vadd.f32 %v695_v23, %v2340_v53  ;;  %v691_v27 = vpop.f32.mrb[15].mxu0 }
 0xb87   :  { %v700_v12 = vadd.f32 %v696_v10, %v2342_v55 }
 0xb88   :  { %v1809_v8 = vmul.f32 -1.442695, %v699_v26 }
 0xb89   :  { %v1810_v32 = vmul.f32 -1.442695, %v700_v12 }
 0xb8a   :  { %2094 = vpow2.f32 %v1809_v8 }
 0xb8b   :  { %2096 = vtanh.f32 %v700_v12 }
 0xb94   :  { %v2095_v28 = vpop.eup %2094 }
 0xb95   :  { %v707_v14 = vadd.f32 1.0, %v2095_v28  ;;  %v2097_v16 = vpop.eup %2096 }
 0xb97   :  { %2098 = vrcp.f32 %v707_v14  ;;  %v2023_v14 = vld [vmem:[#allocation3 + $0x80] ss:$8 sps:$4 sm:$0xff]  }
 0xb98   :  { %2100 = vpow2.f32 %v1810_v32 }
 0xba1   :  { %v2099_v29 = vpop.eup %2098 }
 0xba2   :  { %v718_v30 = vmul.f32 %v2099_v29, %v2097_v16  ;;  %v717_v31 = vmul.f32 %v2099_v29, %v715_v19  ;;  %v2101_v33 = vpop.eup %2100  ;;  %v2026_v16 = vld [vmem:[#allocation3 + $0xb0] ss:$8 sps:$4 sm:$0xff]  }
 0xba3   :  { %v708_v34 = vadd.f32 1.0, %v2101_v33 }
 0xba4   :  { %720 = vrot.lane.b32.xlu1 %v718_v30, %s2227_s12 }
 0xba5   :  { %2102 = vrcp.f32 %v708_v34 }
 0xbaf   :  { %v2103_v37 = vpop.eup %2102 }
 0xc16   :  { %v721_v35 = vpop.permute.xlu1 %720 }
 0xc17   :  { %v723_v36 = vadd.f32 %v721_v35, %v717_v31 }
 0xc19   :  { %2104 = vtanh.f32 %v723_v36  ;;  %v797_v54 = vrot.slane %v723_v36, 6 }
 0xc23   :  { %v2105_v38 = vpop.eup %2104 }
 0xc24   :  { %v725_v4 = vmul.f32 %v2105_v38, %v2103_v37 }
 0xc26   :  { %v726_v39 = vpack.c.bf16 %v725_v4, %v725_v4  ;;  %v2027_v4 = vld [vmem:[#allocation3 + $0xc0] ss:$8 sps:$4 sm:$0xff]  }
 0xc28   :  { %v728_v40 = vrot.slane %v726_v39, 1  ;;  %v75_v39 = vld [vmem:[%s2622_s3 + $0x3] ss:$0 sm:$0xff] }
 0xc2a   :  { %729 = vrot.lane.b32.xlu0 %v728_v40, %s2227_s12 }
 0xc9c   :  { %v730_v48 = vpop.permute.xlu0 %729 }
 0xc9d   :  { %1811 = vmatmul.mubr.msk.bf16.vlgmr.msra.gmra.mrb[12].mxu1 %vm169_vm5, %v730_v48 }
 0xc9e   :  { %1885 = vmatpush3.bf16.msra.mxu1 %v2023_v14  ;;  %1892 = vmatprep.mubr.msk.bf16.mxu1 %vm2228_vm6, %v2225_v24 }
 0xc9f   :  { %1886 = vmatprep.subr.bf16.mxu1 %v2225_v24 }
 0xd70   :  { %v768_v41 = vpop.f32.mrb[12].mxu1 }
 0xd71   :  { %v777_v42 = vrot.slane %v768_v41, 4  ;;  %v770_v43 = vpop.f32.mrb[13].mxu1 }
 0xd72   :  { %v772_v57 = vpop.f32.mrb[14].mxu1  ;;  %v778_v47 = vrot.slane %v770_v43, 4 }
 0xd73   :  { %v781_v44 = vadd.f32 %v777_v42, %v2340_v53  ;;  %v773_v45 = vpop.f32.mrb[15].mxu1 }
 0xd74   :  { %v782_v49 = vadd.f32 %v778_v47, %v2342_v55  ;;  %v2028_v45 = vld [vmem:[#allocation3 + $0xd0] ss:$8 sps:$4 sm:$0xff]  }
 0xd75   :  { %v1812_v46 = vmul.f32 -1.442695, %v781_v44  ;;  %v77_v47 = vld [vmem:[%s2620_s1] sm:$0x3] }
 0xd76   :  { %v1813_v60 = vmul.f32 -1.442695, %v782_v49 }
 0xd77   :  { %2106 = vpow2.f32 %v1812_v46 }
 0xd78   :  { %2108 = vtanh.f32 %v782_v49 }
 0xd81   :  { %v2107_v50 = vpop.eup %2106 }
 0xd82   :  { %v789_v51 = vadd.f32 1.0, %v2107_v50  ;;  %v2109_v52 = vpop.eup %2108 }
 0xd84   :  { %2110 = vrcp.f32 %v789_v51 }
 0xd85   :  { %2112 = vpow2.f32 %v1813_v60 }
 0xd8e   :  { %v2111_v56 = vpop.eup %2110 }
 0xd8f   :  { %v800_v58 = vmul.f32 %v2111_v56, %v2109_v52  ;;  %v799_v59 = vmul.f32 %v2111_v56, %v797_v54  ;;  %v2113_v61 = vpop.eup %2112  ;;  %v2452_v52 = vld [vmem:[#allocation3 + $0xf0] ss:$8 sps:$4 sm:$0xff]   ;;  %v2458_v56 = vld [vmem:[#allocation3 + $0x100] ss:$8 sps:$4 sm:$0xff]  }
 0xd90   :  { %v790_v62 = vadd.f32 1.0, %v2113_v61 }
 0xd91   :  { %802 = vrot.lane.b32.xlu1 %v800_v58, %s2227_s12  ;;  %v2030_v58 = vld [vmem:[#allocation3 + $0xe0] ss:$8 sps:$4 sm:$0xff]  }
 0xd92   :  { %2114 = vrcp.f32 %v790_v62 }
 0xd9c   :  { %v2115_v2 = vpop.eup %2114 }
 0xe03   :  { %v803_v63 = vpop.permute.xlu1 %802 }
 0xe04   :  { %v805_v0 = vadd.f32 %v803_v63, %v799_v59  ;;  %v76_v59 = vld [vmem:[%s2622_s3 + $0x4] ss:$0 sm:$0xff] }
 0xe06   :  { %2116 = vtanh.f32 %v805_v0  ;;  %v879_v8 = vrot.slane %v805_v0, 6 }
 0xe10   :  { %v2117_v3 = vpop.eup %2116 }
 0xe11   :  { %v807_v5 = vmul.f32 %v2117_v3, %v2115_v2 }
 0xe13   :  { %v808_v7 = vpack.c.bf16 %v807_v5, %v807_v5 }
 0xe15   :  { %v810_v9 = vrot.slane %v808_v7, 2 }
 0xe17   :  { %811 = vrot.lane.b32.xlu0 %v810_v9, %s2227_s12  ;;  %v73_v9 = vld [vmem:[%s2622_s3 + $0x1] ss:$0 sm:$0xff] }
 0xe89   :  { %v812_v11 = vpop.permute.xlu0 %811 }
 0xe8a   :  { %1814 = vmatmul.mubr.msk.bf16.vlgmr.msra.gmra.mrb[16].mxu0 %vm169_vm5, %v812_v11 }
 0xe8b   :  { %1898 = vmatprep.mubr.msk.bf16.mxu0 %vm2228_vm6, %v2225_v24  ;;  %1897 = vmatpush3.bf16.msra.mxu0 %v2027_v4 }
 0xe8c   :  { %1910 = vmatprep.subr.bf16.mxu0 %v2225_v24 }
 0xf5d   :  { %v850_v13 = vpop.f32.mrb[16].mxu0 }
 0xf5e   :  { %v859_v15 = vrot.slane %v850_v13, 2  ;;  %v852_v17 = vpop.f32.mrb[17].mxu0 }
 0xf5f   :  { %v854_v18 = vpop.f32.mrb[18].mxu0  ;;  %v860_v23 = vrot.slane %v852_v17, 2 }
 0xf60   :  { %v863_v20 = vadd.f32 %v859_v15, %v2340_v53  ;;  %v855_v21 = vpop.f32.mrb[19].mxu0  ;;  %v2024_v53 = vld [vmem:[#allocation3 + $0x90] ss:$8 sps:$4 sm:$0xff]  }
 0xf61   :  { %v864_v25 = vadd.f32 %v860_v23, %v2342_v55  ;;  %1887 = vmatpush3.bf16.msra.mxu1 %v2024_v53  ;;  %v2025_v55 = vld [vmem:[#allocation3 + $0xa0] ss:$8 sps:$4 sm:$0xff]  }
 0xf62   :  { %v1815_v22 = vmul.f32 -1.442695, %v863_v20  ;;  %1888 = vmatprep.subr.bf16.mxu1 %v2225_v24 }
 0xf63   :  { %v1816_v19 = vmul.f32 -1.442695, %v864_v25 }
 0xf64   :  { %2118 = vpow2.f32 %v1815_v22 }
 0xf65   :  { %2120 = vtanh.f32 %v864_v25  ;;  %1889 = vmatpush3.bf16.msra.mxu1 %v2025_v55 }
 0xf66   :  { %1890 = vmatprep.subr.bf16.mxu1 %v2225_v24 }
 0xf69   :  { %1891 = vmatpush3.bf16.msra.mxu1 %v2026_v16 }
 0xf6a   :  { %1902 = vmatprep.subr.bf16.mxu1 %v2225_v24 }
 0xf6e   :  { %v2119_v6 = vpop.eup %2118 }
 0xf6f   :  { %v871_v26 = vadd.f32 1.0, %v2119_v6  ;;  %v2121_v27 = vpop.eup %2120 }
 0xf71   :  { %2122 = vrcp.f32 %v871_v26 }
 0xf72   :  { %2124 = vpow2.f32 %v1816_v19 }
 0xf7b   :  { %v2123_v10 = vpop.eup %2122 }
 0xf7c   :  { %v882_v12 = vmul.f32 %v2123_v10, %v2121_v27  ;;  %v881_v28 = vmul.f32 %v2123_v10, %v879_v8  ;;  %v2125_v29 = vpop.eup %2124 }
 0xf7d   :  { %v872_v30 = vadd.f32 1.0, %v2125_v29 }
 0xf7e   :  { %884 = vrot.lane.b32.xlu1 %v882_v12, %s2227_s12 }
 0xf7f   :  { %2126 = vrcp.f32 %v872_v30 }
 0xf89   :  { %v2127_v33 = vpop.eup %2126 }
 0xff0   :  { %v885_v31 = vpop.permute.xlu1 %884 }
 0xff1   :  { %v887_v32 = vadd.f32 %v885_v31, %v881_v28 }
 0xff3   :  { %2128 = vtanh.f32 %v887_v32 }
 0xffd   :  { %v2129_v34 = vpop.eup %2128 }
 0xffe   :  { %v889_v35 = vmul.f32 %v2129_v34, %v2127_v33 }
0x1000   :  { %v890_v36 = vpack.c.bf16 %v889_v35, %v889_v35 }
0x1002   :  { %v892_v37 = vrot.slane %v890_v36, 3 }
0x1004   :  { %893 = vrot.lane.b32.xlu0 %v892_v37, %s2227_s12 }
0x1076   :  { %v894_v38 = vpop.permute.xlu0 %893 }
0x1077   :  { %1893 = vmatmul.mubr.msk.bf16.vlgmr.msra.gmra.mrb[16].mxu1 %vm169_vm5, %v894_v38 }
0x1078   :  { %1906 = vmatprep.mubr.msk.bf16.mxu1 %vm2228_vm6, %v2225_v24  ;;  %1903 = vmatpush3.bf16.msra.mxu1 %v2028_v45 }
0x1079   :  { %1904 = vmatprep.subr.bf16.mxu1 %v2225_v24 }
0x107c   :  { %1905 = vmatpush3.bf16.msra.mxu1 %v2030_v58 }
0x107d   :  { %1918 = vmatprep.subr.bf16.mxu1 %v2225_v24 }
0x114a   :  { %v956_v40 = vpop.f32.mrb[16].mxu1 }
0x114b   :  { %v957_v48 = vadd.f32 %v956_v40, %v75_v39  ;;  %v1894_v41 = vpop.f32.mrb[17].mxu1 }
0x114c   :  { %v959_v42 = vpop.f32.mrb[18].mxu1 }
0x114d   :  { %963 = vst.msk [vmem:[%s2624_s5] sm:$0x3] %vm962_vm7, %v957_v48  ;;  %v964_v43 = vmul.f32 0.5, %v957_v48  ;;  %v1895_v57 = vpop.f32.mrb[19].mxu1 }
0x114f   :  { %v965_v44 = vmul.f32 1.442695, %v964_v43 }
0x1151   :  { %2130 = vpow2.f32 %v965_v44 }
0x115b   :  { %v2131_v46 = vpop.eup %2130 }
0x115c   :  { %968 = vrot.lane.b32.xlu1 %v2131_v46, %s2229_s17 }
0x11ce   :  { %v969_v49 = vpop.permute.xlu1 %968 }
0x11cf   :  { %v971_v50 = vmul.f32 %v969_v49, %v77_v47 }
0x11d1   :  { %v972_v51 = vadd.f32 %v971_v50, %v957_v48 }
0x11d3   :  { %v973_v54 = vpack.c.bf16 %v972_v51, %v972_v51 }
0x11d5   :  { %1899 = vmatmul.mubr.msk.bf16.vlgmr.msra.gmra.mrb[20].mxu0 %vm980_vm8, %v973_v54 }
0x11d6   :  { %1911 = vmatpush3.bf16.msra.mxu0 %v2452_v52  ;;  %1914 = vmatprep.mubr.msk.bf16.mxu0 %vm2228_vm6, %v2225_v24 }
0x11d7   :  { %1912 = vmatprep.subr.bf16.mxu0 %v2225_v24 }
0x11da   :  { %1913 = vmatpush3.bf16.msra.mxu0 %v2458_v56 }
0x11db   :  { %1926 = vmatprep.subr.bf16.mxu0 %v2225_v24 }
0x11dd   :  { %1915 = vmatmul.mubr.bf16.vlgmr.msra.gmra.mrb[24].mxu0 %v2224_v1 }
0x11de   :  { %1927 = vmatpush3.bf16.msra.mxu0 %v2452_v52  ;;  %1930 = vmatprep.mubr.msk.bf16.mxu0 %vm2228_vm6, %v2225_v24 }
0x11df   :  { %1928 = vmatprep.subr.bf16.mxu0 %v2225_v24 }
0x11e2   :  { %1929 = vmatpush3.bf16.msra.mxu0 %v2458_v56 }
0x11e3   :  { %1942 = vmatprep.subr.bf16.mxu0 %v2225_v24 }
0x12a8   :  { %v1018_v60 = vpop.f32.mrb[20].mxu0 }
0x12a9   :  { %v1019_v61 = vadd.f32 %v1018_v60, %v76_v59  ;;  %v1900_v62 = vpop.f32.mrb[21].mxu0 }
0x12aa   :  { %v1021_v63 = vpop.f32.mrb[22].mxu0 }
0x12ab   :  { %v1024_v1 = vpack.c.bf16 %v1019_v61, %v1019_v61  ;;  %v1901_v0 = vpop.f32.mrb[23].mxu0 }
0x12ad   :  { %1907 = vmatmul.mubr.msk.bf16.vlgmr.msra.gmra.mrb[20].mxu1 %vm114_vm4, %v1024_v1 }
0x12ae   :  { %1919 = vmatpush3.bf16.msra.mxu1 %v2452_v52  ;;  %1922 = vmatprep.mubr.msk.bf16.mxu1 %vm2228_vm6, %v2225_v24 }
0x12af   :  { %1920 = vmatprep.subr.bf16.mxu1 %v2225_v24 }
0x12b0   :  { %v1128_v2 = vpop.f32.mrb[24].mxu0 }
0x12b1   :  { %v1916_v3 = vpop.f32.mrb[25].mxu0 }
0x12b2   :  { %1921 = vmatpush3.bf16.msra.mxu1 %v2458_v56  ;;  %v1131_v5 = vpop.f32.mrb[26].mxu0 }
0x12b3   :  { %1934 = vmatprep.subr.bf16.mxu1 %v2225_v24  ;;  %v1917_v7 = vpop.f32.mrb[27].mxu0 }
0x1380   :  { %v1074_v11 = vpop.f32.mrb[20].mxu1 }
0x1381   :  { %v2483_v13 = vadd.f32 %v1074_v11, %v73_v9  ;;  %v1908_v15 = vpop.f32.mrb[21].mxu1 }
0x1382   :  { %v1077_v17 = vpop.f32.mrb[22].mxu1 }
0x1383   :  { %v1909_v18 = vpop.f32.mrb[23].mxu1  ;;  %v1134_v20 = vadd.f32 %v1128_v2, %v2483_v13 }
0x1385   :  { %2132 = vtanh.f32 %v1134_v20  ;;  %v1829_v22 = vmul.f32 -1.442695, %v1134_v20 }
0x1387   :  { %2134 = vpow2.f32 %v1829_v22 }
0x138f   :  { %v2133_v21 = vpop.eup %2132 }
0x1390   :  { %1144 = vrot.lane.b32.xlu0 %v2133_v21, %s2227_s12 }
0x1391   :  { %v2135_v23 = vpop.eup %2134 }
0x1392   :  { %v1138_v25 = vadd.f32 1.0, %v2135_v23 }
0x1394   :  { %2136 = vrcp.f32 %v1138_v25 }
0x139e   :  { %v2137_v6 = vpop.eup %2136 }
0x139f   :  { %v1142_v8 = vmul.f32 0.0, %v2137_v6 }
0x1402   :  { %v1145_v26 = vpop.permute.xlu0 %1144 }
0x1403   :  { %v1147_v27 = vmul.f32 %v2137_v6, %v1145_v26 }
0x1405   :  { %1149 = vrot.lane.b32.xlu1 %v1147_v27, %s2226_s0 }
0x1477   :  { %v1150_v10 = vpop.permute.xlu1 %1149 }
0x1478   :  { %v1152_v12 = vadd.f32 %v1150_v10, %v1142_v8 }
0x147a   :  { %2138 = vtanh.f32 %v1152_v12 }
0x1484   :  { %v2139_v28 = vpop.eup %2138 }
0x1485   :  { %1155 = vrot.lane.b32.xlu0 %v2139_v28, %s2227_s12 }
0x14f7   :  { %v1156_v14 = vpop.permute.xlu0 %1155 }
0x14f8   :  { %v2489_v53 = vmul.f32 %v2137_v6, %v1156_v14 }
0x14fa   :  { %v1164_v55 = vpack.c.bf16 %v2489_v53, %v2489_v53 }
0x14fc   :  { %1166 = vrot.lane.b32.xlu1 %v1164_v55, %s2226_s0 }
0x156e   :  { %v1167_v16 = vpop.permute.xlu1 %1166 }
0x156f   :  { %1923 = vmatmul.mubr.msk.bf16.vlgmr.msra.gmra.mrb[24].mxu1 %vm114_vm4, %v1167_v16 }
0x1570   :  { %1935 = vmatpush3.bf16.msra.mxu1 %v2452_v52  ;;  %1938 = vmatprep.mubr.msk.bf16.mxu1 %vm2228_vm6, %v2225_v24 }
0x1571   :  { %1936 = vmatprep.subr.bf16.mxu1 %v2225_v24 }
0x1574   :  { %1937 = vmatpush3.bf16.msra.mxu1 %v2458_v56 }
0x1575   :  { %1950 = vmatprep.subr.bf16.mxu1 %v2225_v24 }
0x1642   :  { %v1205_v19 = vpop.f32.mrb[24].mxu1 }
0x1643   :  { %v1211_v29 = vadd.f32 %v1205_v19, %v2483_v13  ;;  %v1924_v30 = vpop.f32.mrb[25].mxu1 }
0x1644   :  { %v1208_v31 = vpop.f32.mrb[26].mxu1 }
0x1645   :  { %2140 = vtanh.f32 %v1211_v29  ;;  %v1925_v32 = vpop.f32.mrb[27].mxu1  ;;  %v1831_v34 = vmul.f32 -1.442695, %v1211_v29 }
0x1647   :  { %2142 = vpow2.f32 %v1831_v34 }
0x164f   :  { %v2141_v33 = vpop.eup %2140 }
0x1650   :  { %1221 = vrot.lane.b32.xlu0 %v2141_v33, %s2227_s12 }
0x1651   :  { %v2143_v35 = vpop.eup %2142 }
0x1652   :  { %v1215_v36 = vadd.f32 1.0, %v2143_v35 }
0x1654   :  { %2144 = vrcp.f32 %v1215_v36 }
0x165e   :  { %v2145_v37 = vpop.eup %2144 }
0x165f   :  { %v1219_v39 = vmul.f32 %v2145_v37, %v1152_v12 }
0x16c2   :  { %v1222_v38 = vpop.permute.xlu0 %1221 }
0x16c3   :  { %v1224_v4 = vmul.f32 %v2145_v37, %v1222_v38 }
0x16c5   :  { %1226 = vrot.lane.b32.xlu1 %v1224_v4, %s2226_s0 }
0x1737   :  { %v1227_v40 = vpop.permute.xlu1 %1226 }
0x1738   :  { %v1229_v48 = vadd.f32 %v1227_v40, %v1219_v39 }
0x173a   :  { %2146 = vtanh.f32 %v1229_v48 }
0x1744   :  { %v2147_v41 = vpop.eup %2146 }
0x1745   :  { %1232 = vrot.lane.b32.xlu0 %v2147_v41, %s2227_s12 }
0x17b7   :  { %v1233_v42 = vpop.permute.xlu0 %1232 }
0x17b8   :  { %v2505_v43 = vmul.f32 %v2145_v37, %v1233_v42 }
0x17ba   :  { %v1241_v57 = vpack.c.bf16 %v2505_v43, %v2505_v43 }
0x17bc   :  { %1243 = vrot.lane.b32.xlu1 %v1241_v57, %s2226_s0 }
0x182e   :  { %v1244_v44 = vpop.permute.xlu1 %1243 }
0x182f   :  { %1931 = vmatmul.mubr.msk.bf16.vlgmr.msra.gmra.mrb[28].mxu0 %vm114_vm4, %v1244_v44 }
0x1830   :  { %1943 = vmatpush3.bf16.msra.mxu0 %v2452_v52  ;;  %1946 = vmatprep.mubr.msk.bf16.mxu0 %vm2228_vm6, %v2225_v24 }
0x1831   :  { %1944 = vmatprep.subr.bf16.mxu0 %v2225_v24 }
0x1834   :  { %1945 = vmatpush3.bf16.msra.mxu0 %v2458_v56 }
0x1835   :  { %1958 = vmatprep.subr.bf16.mxu0 %v2225_v24 }
0x1902   :  { %v1282_v45 = vpop.f32.mrb[28].mxu0 }
0x1903   :  { %v1288_v46 = vadd.f32 %v1282_v45, %v2483_v13  ;;  %v1932_v47 = vpop.f32.mrb[29].mxu0 }
0x1904   :  { %v1285_v49 = vpop.f32.mrb[30].mxu0 }
0x1905   :  { %2148 = vtanh.f32 %v1288_v46  ;;  %v1933_v50 = vpop.f32.mrb[31].mxu0  ;;  %v1833_v54 = vmul.f32 -1.442695, %v1288_v46 }
0x1907   :  { %2150 = vpow2.f32 %v1833_v54 }
0x190f   :  { %v2149_v51 = vpop.eup %2148 }
0x1910   :  { %1298 = vrot.lane.b32.xlu0 %v2149_v51, %s2227_s12 }
0x1911   :  { %v2151_v58 = vpop.eup %2150 }
0x1912   :  { %v1292_v59 = vadd.f32 1.0, %v2151_v58 }
0x1914   :  { %2152 = vrcp.f32 %v1292_v59 }
0x191e   :  { %v2153_v60 = vpop.eup %2152 }
0x191f   :  { %v1296_v63 = vmul.f32 %v2153_v60, %v1229_v48 }
0x1982   :  { %v1299_v61 = vpop.permute.xlu0 %1298 }
0x1983   :  { %v1301_v62 = vmul.f32 %v2153_v60, %v1299_v61 }
0x1985   :  { %1303 = vrot.lane.b32.xlu1 %v1301_v62, %s2226_s0 }
0x19f7   :  { %v1304_v1 = vpop.permute.xlu1 %1303 }
0x19f8   :  { %v1306_v0 = vadd.f32 %v1304_v1, %v1296_v63 }
0x19fa   :  { %2154 = vtanh.f32 %v1306_v0 }
0x1a04   :  { %v2155_v2 = vpop.eup %2154 }
0x1a05   :  { %1309 = vrot.lane.b32.xlu0 %v2155_v2, %s2227_s12 }
0x1a77   :  { %v1310_v3 = vpop.permute.xlu0 %1309 }
0x1a78   :  { %v2521_v5 = vmul.f32 %v2153_v60, %v1310_v3 }
0x1a7a   :  { %v1318_v7 = vpack.c.bf16 %v2521_v5, %v2521_v5 }
0x1a7c   :  { %1320 = vrot.lane.b32.xlu1 %v1318_v7, %s2226_s0 }
0x1aee   :  { %v1321_v9 = vpop.permute.xlu1 %1320 }
0x1aef   :  { %1939 = vmatmul.mubr.msk.bf16.vlgmr.msra.gmra.mrb[28].mxu1 %vm114_vm4, %v1321_v9 }
0x1af0   :  { %1951 = vmatpush3.bf16.msra.mxu1 %v2452_v52  ;;  %1954 = vmatprep.mubr.msk.bf16.mxu1 %vm2228_vm6, %v2225_v24 }
0x1af1   :  { %1952 = vmatprep.subr.bf16.mxu1 %v2225_v24 }
0x1af4   :  { %1953 = vmatpush3.bf16.msra.mxu1 %v2458_v56 }
0x1af5   :  { %1966 = vmatprep.subr.bf16.mxu1 %v2225_v24 }
0x1bc2   :  { %v1359_v11 = vpop.f32.mrb[28].mxu1 }
0x1bc3   :  { %v1365_v15 = vadd.f32 %v1359_v11, %v2483_v13  ;;  %v1940_v17 = vpop.f32.mrb[29].mxu1 }
0x1bc4   :  { %v1362_v18 = vpop.f32.mrb[30].mxu1 }
0x1bc5   :  { %2156 = vtanh.f32 %v1365_v15  ;;  %v1941_v20 = vpop.f32.mrb[31].mxu1  ;;  %v1835_v22 = vmul.f32 -1.442695, %v1365_v15 }
0x1bc7   :  { %2158 = vpow2.f32 %v1835_v22 }
0x1bcf   :  { %v2157_v21 = vpop.eup %2156 }
0x1bd0   :  { %1375 = vrot.lane.b32.xlu0 %v2157_v21, %s2227_s12 }
0x1bd1   :  { %v2159_v23 = vpop.eup %2158 }
0x1bd2   :  { %v1369_v25 = vadd.f32 1.0, %v2159_v23 }
0x1bd4   :  { %2160 = vrcp.f32 %v1369_v25 }
0x1bde   :  { %v2161_v6 = vpop.eup %2160 }
0x1bdf   :  { %v1373_v8 = vmul.f32 %v2161_v6, %v1306_v0 }
0x1c42   :  { %v1376_v26 = vpop.permute.xlu0 %1375 }
0x1c43   :  { %v1378_v27 = vmul.f32 %v2161_v6, %v1376_v26 }
0x1c45   :  { %1380 = vrot.lane.b32.xlu1 %v1378_v27, %s2226_s0 }
0x1cb7   :  { %v1381_v10 = vpop.permute.xlu1 %1380 }
0x1cb8   :  { %v1383_v12 = vadd.f32 %v1381_v10, %v1373_v8 }
0x1cba   :  { %2162 = vtanh.f32 %v1383_v12 }
0x1cc4   :  { %v2163_v28 = vpop.eup %2162 }
0x1cc5   :  { %1386 = vrot.lane.b32.xlu0 %v2163_v28, %s2227_s12 }
0x1d37   :  { %v1387_v14 = vpop.permute.xlu0 %1386 }
0x1d38   :  { %v2537_v55 = vmul.f32 %v2161_v6, %v1387_v14 }
0x1d3a   :  { %v1395_v16 = vpack.c.bf16 %v2537_v55, %v2537_v55 }
0x1d3c   :  { %1397 = vrot.lane.b32.xlu1 %v1395_v16, %s2226_s0 }
0x1dae   :  { %v1398_v19 = vpop.permute.xlu1 %1397 }
0x1daf   :  { %1947 = vmatmul.mubr.msk.bf16.vlgmr.msra.gmra.mrb[32].mxu0 %vm114_vm4, %v1398_v19 }
0x1db0   :  { %1959 = vmatpush3.bf16.msra.mxu0 %v2452_v52  ;;  %1962 = vmatprep.mubr.msk.bf16.mxu0 %vm2228_vm6, %v2225_v24 }
0x1db1   :  { %1960 = vmatprep.subr.bf16.mxu0 %v2225_v24 }
0x1db4   :  { %1961 = vmatpush3.bf16.msra.mxu0 %v2458_v56 }
0x1db5   :  { %1974 = vmatprep.subr.bf16.mxu0 %v2225_v24 }
0x1e82   :  { %v1436_v29 = vpop.f32.mrb[32].mxu0 }
0x1e83   :  { %v1442_v30 = vadd.f32 %v1436_v29, %v2483_v13  ;;  %v1948_v31 = vpop.f32.mrb[33].mxu0 }
0x1e84   :  { %v1439_v32 = vpop.f32.mrb[34].mxu0 }
0x1e85   :  { %2164 = vtanh.f32 %v1442_v30  ;;  %v1949_v33 = vpop.f32.mrb[35].mxu0  ;;  %v1837_v35 = vmul.f32 -1.442695, %v1442_v30 }
0x1e87   :  { %2166 = vpow2.f32 %v1837_v35 }
0x1e8f   :  { %v2165_v34 = vpop.eup %2164 }
0x1e90   :  { %1452 = vrot.lane.b32.xlu0 %v2165_v34, %s2227_s12 }
0x1e91   :  { %v2167_v36 = vpop.eup %2166 }
0x1e92   :  { %v1446_v37 = vadd.f32 1.0, %v2167_v36 }
0x1e94   :  { %2168 = vrcp.f32 %v1446_v37 }
0x1e9e   :  { %v2169_v38 = vpop.eup %2168 }
0x1e9f   :  { %v1450_v40 = vmul.f32 %v2169_v38, %v1383_v12 }
0x1f02   :  { %v1453_v4 = vpop.permute.xlu0 %1452 }
0x1f03   :  { %v1455_v39 = vmul.f32 %v2169_v38, %v1453_v4 }
0x1f05   :  { %1457 = vrot.lane.b32.xlu1 %v1455_v39, %s2226_s0 }
0x1f77   :  { %v1458_v48 = vpop.permute.xlu1 %1457 }
0x1f78   :  { %v1460_v41 = vadd.f32 %v1458_v48, %v1450_v40 }
0x1f7a   :  { %2170 = vtanh.f32 %v1460_v41 }
0x1f84   :  { %v2171_v42 = vpop.eup %2170 }
0x1f85   :  { %1463 = vrot.lane.b32.xlu0 %v2171_v42, %s2227_s12 }
0x1ff7   :  { %v1464_v57 = vpop.permute.xlu0 %1463 }
0x1ff8   :  { %v2553_v44 = vmul.f32 %v2169_v38, %v1464_v57 }
0x1ffa   :  { %v1472_v45 = vpack.c.bf16 %v2553_v44, %v2553_v44 }
0x1ffc   :  { %1474 = vrot.lane.b32.xlu1 %v1472_v45, %s2226_s0 }
0x206e   :  { %v1475_v46 = vpop.permute.xlu1 %1474 }
0x206f   :  { %1955 = vmatmul.mubr.msk.bf16.vlgmr.msra.gmra.mrb[32].mxu1 %vm114_vm4, %v1475_v46 }
0x2070   :  { %1967 = vmatpush3.bf16.msra.mxu1 %v2452_v52  ;;  %1970 = vmatprep.mubr.msk.bf16.mxu1 %vm2228_vm6, %v2225_v24 }
0x2071   :  { %1968 = vmatprep.subr.bf16.mxu1 %v2225_v24 }
0x2074   :  { %1969 = vmatpush3.bf16.msra.mxu1 %v2458_v56 }
0x2142   :  { %v1513_v47 = vpop.f32.mrb[32].mxu1 }
0x2143   :  { %v1519_v49 = vadd.f32 %v1513_v47, %v2483_v13  ;;  %v1956_v50 = vpop.f32.mrb[33].mxu1  ;;  %v2033_v47 = vld [vmem:[#allocation3 + $0x120] ss:$8 sps:$4 sm:$0xff]  }
0x2144   :  { %v1516_v51 = vpop.f32.mrb[34].mxu1 }
0x2145   :  { %2172 = vtanh.f32 %v1519_v49  ;;  %v1957_v54 = vpop.f32.mrb[35].mxu1  ;;  %v1839_v59 = vmul.f32 -1.442695, %v1519_v49 }
0x2147   :  { %2174 = vpow2.f32 %v1839_v59 }
0x214f   :  { %v2173_v58 = vpop.eup %2172 }
0x2150   :  { %1529 = vrot.lane.b32.xlu0 %v2173_v58, %s2227_s12 }
0x2151   :  { %v2175_v52 = vpop.eup %2174 }
0x2152   :  { %v1523_v60 = vadd.f32 1.0, %v2175_v52  ;;  %v74_v52 = vld [vmem:[%s2622_s3 + $0x2] ss:$0 sm:$0xff] }
0x2154   :  { %2176 = vrcp.f32 %v1523_v60 }
0x215e   :  { %v2177_v61 = vpop.eup %2176 }
0x215f   :  { %v1527_v56 = vmul.f32 %v2177_v61, %v1460_v41 }
0x21c2   :  { %v1530_v62 = vpop.permute.xlu0 %1529 }
0x21c3   :  { %v1532_v63 = vmul.f32 %v2177_v61, %v1530_v62 }
0x21c5   :  { %1534 = vrot.lane.b32.xlu1 %v1532_v63, %s2226_s0 }
0x2237   :  { %v1535_v1 = vpop.permute.xlu1 %1534 }
0x2238   :  { %v1537_v0 = vadd.f32 %v1535_v1, %v1527_v56 }
0x223a   :  { %2178 = vtanh.f32 %v1537_v0 }
0x2244   :  { %v2179_v2 = vpop.eup %2178 }
0x2245   :  { %1540 = vrot.lane.b32.xlu0 %v2179_v2, %s2227_s12 }
0x22b7   :  { %v1541_v3 = vpop.permute.xlu0 %1540 }
0x22b8   :  { %v2568_v7 = vmul.f32 %v2177_v61, %v1541_v3 }
0x22ba   :  { %v1549_v9 = vpack.c.bf16 %v2568_v7, %v2568_v7 }
0x22bc   :  { %1551 = vrot.lane.b32.xlu1 %v1549_v9, %s2226_s0 }
0x232e   :  { %v1552_v11 = vpop.permute.xlu1 %1551 }
0x232f   :  { %1963 = vmatmul.mubr.msk.bf16.vlgmr.msra.gmra.mrb[36].mxu0 %vm114_vm4, %v1552_v11 }
0x2330   :  { %1978 = vmatprep.mubr.msk.bf16.mxu0 %vm2228_vm6, %v2225_v24 }
0x2402   :  { %v1590_v15 = vpop.f32.mrb[36].mxu0 }
0x2403   :  { %v1596_v17 = vadd.f32 %v1590_v15, %v2483_v13  ;;  %v1964_v18 = vpop.f32.mrb[37].mxu0 }
0x2404   :  { %v1593_v20 = vpop.f32.mrb[38].mxu0 }
0x2405   :  { %2180 = vtanh.f32 %v1596_v17  ;;  %v1965_v21 = vpop.f32.mrb[39].mxu0  ;;  %v1841_v23 = vmul.f32 -1.442695, %v1596_v17 }
0x2407   :  { %2182 = vpow2.f32 %v1841_v23 }
0x240f   :  { %v2181_v22 = vpop.eup %2180 }
0x2410   :  { %1606 = vrot.lane.b32.xlu0 %v2181_v22, %s2227_s12 }
0x2411   :  { %v2183_v25 = vpop.eup %2182 }
0x2412   :  { %v1600_v6 = vadd.f32 1.0, %v2183_v25 }
0x2414   :  { %2184 = vrcp.f32 %v1600_v6 }
0x241e   :  { %v2185_v26 = vpop.eup %2184 }
0x241f   :  { %v1604_v10 = vmul.f32 %v2185_v26, %v1537_v0 }
0x2482   :  { %v1607_v27 = vpop.permute.xlu0 %1606 }
0x2483   :  { %v1609_v8 = vmul.f32 %v2185_v26, %v1607_v27 }
0x2485   :  { %1611 = vrot.lane.b32.xlu1 %v1609_v8, %s2226_s0 }
0x24f7   :  { %v1612_v12 = vpop.permute.xlu1 %1611 }
0x24f8   :  { %v1614_v28 = vadd.f32 %v1612_v12, %v1604_v10 }
0x24fa   :  { %2186 = vtanh.f32 %v1614_v28 }
0x2504   :  { %v2187_v14 = vpop.eup %2186 }
0x2505   :  { %1617 = vrot.lane.b32.xlu0 %v2187_v14, %s2227_s12 }
0x2577   :  { %v1618_v16 = vpop.permute.xlu0 %1617 }
0x2578   :  { %v1620_v19 = vmul.f32 %v2185_v26, %v1618_v16 }
0x257a   :  { %v1626_v29 = vpack.c.bf16 %v1620_v19, %v1620_v19 }
0x257c   :  { %1628 = vrot.lane.b32.xlu1 %v1626_v29, %s2226_s0 }
0x25ee   :  { %v1629_v30 = vpop.permute.xlu1 %1628 }
0x25ef   :  { %1971 = vmatmul.mubr.msk.bf16.vlgmr.msra.gmra.mrb[36].mxu1 %vm114_vm4, %v1629_v30 }
0x26c2   :  { %v1667_v31 = vpop.f32.mrb[36].mxu1 }
0x26c3   :  { %v1673_v32 = vadd.f32 %v1667_v31, %v2483_v13  ;;  %v1972_v33 = vpop.f32.mrb[37].mxu1 }
0x26c4   :  { %v1670_v34 = vpop.f32.mrb[38].mxu1 }
0x26c5   :  { %2188 = vtanh.f32 %v1673_v32  ;;  %v1973_v35 = vpop.f32.mrb[39].mxu1  ;;  %v1843_v37 = vmul.f32 -1.442695, %v1673_v32 }
0x26c7   :  { %2190 = vpow2.f32 %v1843_v37 }
0x26cf   :  { %v2189_v36 = vpop.eup %2188 }
0x26d0   :  { %1683 = vrot.lane.b32.xlu0 %v2189_v36, %s2227_s12 }
0x26d1   :  { %v2191_v38 = vpop.eup %2190 }
0x26d2   :  { %v1677_v4 = vadd.f32 1.0, %v2191_v38 }
0x26d4   :  { %2192 = vrcp.f32 %v1677_v4 }
0x26de   :  { %v2193_v39 = vpop.eup %2192 }
0x26df   :  { %v1681_v13 = vmul.f32 %v2193_v39, %v1614_v28 }
0x2742   :  { %v1684_v40 = vpop.permute.xlu0 %1683 }
0x2743   :  { %v1686_v48 = vmul.f32 %v2193_v39, %v1684_v40 }
0x2745   :  { %1688 = vrot.lane.b32.xlu1 %v1686_v48, %s2226_s0 }
0x2749   :  { %1160 = vrot.lane.b32.xlu1 %v2489_v53, %s2226_s0 }
0x274d   :  { %1314 = vrot.lane.b32.xlu1 %v2521_v5, %s2226_s0 }
0x2751   :  { %1468 = vrot.lane.b32.xlu1 %v2553_v44, %s2226_s0  ;;  %v2032_v44 = vld [vmem:[#allocation3 + $0x110] ss:$8 sps:$4 sm:$0xff]  }
0x2752   :  { %1975 = vmatpush3.bf16.msra.mxu0 %v2032_v44 }
0x2753   :  { %1976 = vmatprep.subr.bf16.mxu0 %v2225_v24 }
0x2755   :  { %1622 = vrot.lane.b32.xlu1 %v1620_v19, %s2226_s0 }
0x2756   :  { %1977 = vmatpush3.bf16.msra.mxu0 %v2033_v47 }
0x27b7   :  { %v1689_v41 = vpop.permute.xlu1 %1688 }
0x27b8   :  { %v1691_v42 = vadd.f32 %v1689_v41, %v1681_v13 }
0x27ba   :  { %2194 = vtanh.f32 %v1691_v42 }
0x27bb   :  { %v1161_v57 = vpop.permute.xlu1 %1160 }
0x27bc   :  { %1163 = vst.msk [vmem:[#allocation2] sm:$0x3] %vm962_vm7, %v1161_v57 }
0x27bf   :  { %v1315_v45 = vpop.permute.xlu1 %1314 }
0x27c0   :  { %1317 = vst.msk [vmem:[#allocation2 + $0x4] sm:$0x3] %vm962_vm7, %v1315_v45 }
0x27c3   :  { %v1469_v46 = vpop.permute.xlu1 %1468 }
0x27c4   :  { %v2195_v53 = vpop.eup %2194  ;;  %1471 = vst.msk [vmem:[#allocation2 + $0x8] sm:$0x3] %vm962_vm7, %v1469_v46 }
0x27c5   :  { %1694 = vrot.lane.b32.xlu0 %v2195_v53, %s2227_s12 }
0x27c7   :  { %v1623_v5 = vpop.permute.xlu1 %1622 }
0x27c8   :  { %1625 = vst.msk [vmem:[#allocation2 + $0xc] sm:$0x3] %vm962_vm7, %v1623_v5 }
0x27c9   :  { %1237 = vrot.lane.b32.xlu0 %v2505_v43, %s2226_s0 }
0x27cd   :  { %1391 = vrot.lane.b32.xlu0 %v2537_v55, %s2226_s0 }
0x27d1   :  { %1545 = vrot.lane.b32.xlu0 %v2568_v7, %s2226_s0 }
0x2837   :  { %v1695_v49 = vpop.permute.xlu0 %1694 }
0x2838   :  { %v1697_v50 = vmul.f32 %v2193_v39, %v1695_v49 }
0x283a   :  { %1699 = vrot.lane.b32.xlu0 %v1697_v50, %s2226_s0 }
0x283b   :  { %v1238_v51 = vpop.permute.xlu0 %1237 }
0x283c   :  { %1240 = vst.msk [vmem:[#allocation2 + $0x2] sm:$0x3] %vm962_vm7, %v1238_v51 }
0x283f   :  { %v1392_v43 = vpop.permute.xlu0 %1391 }
0x2840   :  { %1394 = vst.msk [vmem:[#allocation2 + $0x6] sm:$0x3] %vm962_vm7, %v1392_v43 }
0x2843   :  { %v1546_v55 = vpop.permute.xlu0 %1545 }
0x2844   :  { %1548 = vst.msk [vmem:[#allocation2 + $0xa] sm:$0x3] %vm962_vm7, %v1546_v55 }
0x2847   :  { %v1703_v58 = vld [vmem:[#allocation2] sm:$0xff] }
0x28ac   :  { %v1700_v54 = vpop.permute.xlu0 %1699 }
0x28ad   :  { %1702 = vst.msk [vmem:[#allocation2 + $0xe] sm:$0x3] %vm962_vm7, %v1700_v54 }
0x28b4   :  { %v1704_v59 = vld [vmem:[#allocation2 + $0x8] sm:$0xff] }
0x28b5   :  { %v1705_v24 = vpack.c.bf16 %v1704_v59, %v1703_v58 }
0x28b7   :  { %1979 = vmatmul.mubr.msk.bf16.vlgmr.msra.gmra.mrb[40].mxu0 %vm114_vm4, %v1705_v24 }
0x298a   :  { %v1755_v60 = vpop.f32.mrb[40].mxu0 }
0x298b   :  { %v1756_v61 = vadd.f32 %v1755_v60, %v74_v52  ;;  %v1980_v62 = vpop.f32.mrb[41].mxu0 }
0x298c   :  { %v1758_v63 = vpop.f32.mrb[42].mxu0 }
0x298d   :  { %1762 = vst [vmem:[%s2623_s4] sm:$0xff] %v1756_v61  ;;  %v1759_v56 = vadd.f32 %v1758_v63, %v74_v52  ;;  %v1981_v1 = vpop.f32.mrb[43].mxu0 }
0x298f   :  { %1763 = vst [vmem:[%s2623_s4 + $0x8] sm:$0xff] %v1759_v56 }
0x2990   :  { %1772 = vsyncpa [#allocation4], 1 }

</bundles_post_ra>
